<compile_context>
chip_gen: v6e
topology: v6e:2x2x1
jax: 0.10.0
libtpu: 0.0.40
codegen_flags: <defaults>
</compile_context>

<pallas_src>
import jax
import jax.numpy as jnp
from jax import lax
from jax.experimental import pallas as pl
from jax.experimental.pallas import tpu as pltpu

# --- small synthetic BERT config (real bert-base: H=768, 12 layers, 12 heads) ---
VOCAB = 64
MAX_POS = 16
TYPE_VOCAB = 2
H = 128              # hidden size (lane aligned)
I = 512              # intermediate size (4*H)
NUM_HEADS = 2
HEAD_DIM = H // NUM_HEADS
NUM_LAYERS = 2
LN_EPS = 1e-12
MASK_MIN = -1e9      # HF-BERT-style additive mask for padded keys


def _layernorm(x, g, b):
    mu = jnp.mean(x, axis=-1, keepdims=True)
    var = jnp.mean((x - mu) ** 2, axis=-1, keepdims=True)
    return (x - mu) * lax.rsqrt(var + LN_EPS) * g + b


# ----------------------------- fused Pallas kernel -----------------------------

def make_fused_kernel(BB, S, pool_mode):
    """Whole-forward kernel.

    grid = (B // BB, NUM_LAYERS): outer axis over batch blocks ("parallel"),
    inner axis over layers ("arbitrary").  The hidden state for the current
    batch block lives in a VMEM scratch across the layer axis.
    """
    RB = BB * S

    def kernel(emb_ref, mask_ref, pool_ref, embg_ref, embb_ref,
               wqkv_ref, bqkv_ref, wo_ref, bo_ref, ln1g_ref, ln1b_ref,
               w1_ref, b1_ref, w2_ref, b2_ref, ln2g_ref, ln2b_ref,
               o_ref, hid_ref, ctx_ref):
        l = pl.program_id(1)

        # layer 0: embedding LayerNorm into the resident hidden state
        @pl.when(l == 0)
        def _():
            hid_ref[...] = _layernorm(emb_ref[...].reshape(RB, H),
                                      embg_ref[...], embb_ref[...])

        x = hid_ref[...]                          # (RB, H) f32
        x_bf = x.astype(jnp.bfloat16)

        # per-batch additive key mask built in-kernel from a (BB,1,S) vector
        # (no O((B*S)^2) bias DMA); kept in f32 so -1e9 can't swamp bf16 logits.
        maskadd = (1.0 - mask_ref[...]) * MASK_MIN        # (BB, 1, S)

        # --- fused QKV projection: one (RB,H)@(H,3H) bf16 matmul -------------
        # (1/sqrt(head_dim) is folded into the Q columns of wqkv at init)
        qkv = jnp.dot(x_bf, wqkv_ref[...],
                      preferred_element_type=jnp.float32) + bqkv_ref[...]
        q = qkv[:, 0:H].reshape(BB, S, H)
        k = qkv[:, H:2 * H].reshape(BB, S, H)
        v = qkv[:, 2 * H:3 * H].reshape(BB, S, H)

        # --- per-head attention on (BB,S,·) tiles; bf16 MXU inputs ------------
        for hh in range(NUM_HEADS):               # static, small head count
            lo = hh * HEAD_DIM
            qh = q[:, :, lo:lo + HEAD_DIM].astype(jnp.bfloat16)
            kh = k[:, :, lo:lo + HEAD_DIM].astype(jnp.bfloat16)
            vh = v[:, :, lo:lo + HEAD_DIM].astype(jnp.bfloat16)
            s = jnp.einsum('bqd,bkd->bqk', qh, kh,
                           preferred_element_type=jnp.float32) + maskadd
            s = s - jnp.max(s, axis=-1, keepdims=True)      # stable softmax (f32)
            p = jnp.exp(s)
            p = p * pl.reciprocal(jnp.sum(p, axis=-1, keepdims=True), approx=True)
            ctx_h = jnp.einsum('bqk,bkd->bqd', p.astype(jnp.bfloat16), vh,
                               preferred_element_type=jnp.float32)
            ctx_ref[:, lo:lo + HEAD_DIM] = ctx_h.reshape(RB, HEAD_DIM)

        # single fused output projection (R,H)@(H,H) instead of per-head K=64
        attn = jnp.dot(ctx_ref[...].astype(jnp.bfloat16), wo_ref[...],
                       preferred_element_type=jnp.float32) + bo_ref[...]
        x1 = _layernorm(attn + x, ln1g_ref[...], ln1b_ref[...])

        # --- feed forward ----------------------------------------------------
        h1 = jnp.dot(x1.astype(jnp.bfloat16), w1_ref[...],
                     preferred_element_type=jnp.float32) + b1_ref[...]
        h1 = jax.nn.gelu(h1, approximate=True)     # tanh-GELU (EUP)
        h2 = jnp.dot(h1.astype(jnp.bfloat16), w2_ref[...],
                     preferred_element_type=jnp.float32) + b2_ref[...]
        x2 = _layernorm(h2 + x1, ln2g_ref[...], ln2b_ref[...])
        hid_ref[...] = x2

        # last layer: pooling (token 0 / padding folded into pool weights)
        @pl.when(l == pl.num_programs(1) - 1)
        def _():
            x3 = x2.reshape(BB, S, H)
            pw = pool_ref[...]                     # (BB, S, 1)
            if pool_mode == "max":
                # additive -1e9 stands in for the reference's -inf
                o_ref[...] = jnp.max(x3 + pw, axis=1, keepdims=True)
            else:
                num = jnp.sum(x3 * pw, axis=1, keepdims=True)     # (BB,1,H)
                if pool_mode == "avg":
                    den = jnp.sum(pw, axis=1, keepdims=True)      # (BB,1,1)
                    num = num * pl.reciprocal(den, approx=True)
                o_ref[...] = num                   # "cls": one-hot weights

    return kernel


# ----------------------------- wrapper -----------------------------

def encoder_bert_forward(params, input_ids, attention_mask, pooling_type="avg",
                         batch_block=None):
    B, S = input_ids.shape
    BB = B if batch_block is None else batch_block
    assert B % BB == 0, "batch_block must divide the batch"
    maskf = attention_mask.astype(jnp.float32)

    # --- BERT embeddings (table gathers left to XLA) ---
    emb = (jnp.take(params["word_emb"], input_ids, axis=0)
           + params["pos_emb"][:S][None, :, :]
           + params["type_emb"][0][None, None, :])          # (B, S, H), token_type=0

    # key-validity vector (B,1,S); the (-1e9) mask is built in-kernel from this
    keymask = maskf.reshape(B, 1, S)

    # --- pooling weights: "drop token 0" of the reference folded into the mask ---
    pos = jnp.arange(S)[None, :]
    if pooling_type in ("avg", "average"):
        pool_w = jnp.where(pos == 0, 0.0, maskf)
        mode = "avg"
    elif pooling_type in ("max", "max_pooling"):
        pool_w = jnp.where((pos == 0) | (maskf == 0.0), MASK_MIN, 0.0)
        mode = "max"
    elif pooling_type == "cls":
        pool_w = jnp.broadcast_to(jnp.where(pos == 0, 1.0, 0.0), (B, S))
        mode = "cls"
    else:
        raise NotImplementedError("Incorrect pooling type for Transformer encoder")
    pool_w = pool_w.astype(jnp.float32).reshape(B, S, 1)

    kernel = make_fused_kernel(BB, S, mode)

    def cspec(shape):                       # constant block (layer & batch invariant)
        n = len(shape)
        return pl.BlockSpec(shape, lambda bi, l, n=n: (0,) * n)

    def bspec(shape):                       # batch-tiled, layer invariant
        n = len(shape)
        return pl.BlockSpec(shape, lambda bi, l, n=n: (bi,) + (0,) * (n - 1))

    def lspec(shape):                       # per-layer block (layer dim squeezed)
        n = len(shape)
        return pl.BlockSpec((None,) + shape, lambda bi, l, n=n: (l,) + (0,) * n)

    in_specs = [
        bspec((BB, S, H)),                                   # emb
        bspec((BB, 1, S)),                                   # key-valid mask
        bspec((BB, S, 1)),                                   # pooling weights
        cspec((1, H)), cspec((1, H)),                        # emb LN gamma/beta
        lspec((H, 3 * H)), lspec((1, 3 * H)),                # wqkv (q pre-scaled), bqkv
        lspec((H, H)), lspec((1, H)),                        # wo, bo
        lspec((1, H)), lspec((1, H)),                        # ln1
        lspec((H, I)), lspec((1, I)),                        # w1, b1
        lspec((I, H)), lspec((1, H)),                        # w2, b2
        lspec((1, H)), lspec((1, H)),                        # ln2
    ]

    inputs = (emb, keymask, pool_w,
              params["emb_ln_g"], params["emb_ln_b"],
              params["wqkv"], params["bqkv"], params["wo"], params["bo"],
              params["ln1_g"], params["ln1_b"],
              params["w1"], params["b1"], params["w2"], params["b2"],
              params["ln2_g"], params["ln2_b"])

    R = B * S
    n_bblocks = B // BB
    flops = NUM_LAYERS * (2 * R * H * 3 * H + 2 * R * H * H
                          + 4 * B * S * S * H + 4 * R * H * I) + 12 * R * H
    transcendentals = NUM_LAYERS * (NUM_HEADS * B * S * S + R * I)
    w_keys = ("wqkv", "bqkv", "wo", "bo", "ln1_g", "ln1_b",
              "w1", "b1", "w2", "b2", "ln2_g", "ln2_b")
    w_bytes = sum(int(params[k].size) * params[k].dtype.itemsize for k in w_keys)
    act_bytes = (emb.size + keymask.size + pool_w.size + 2 * H) * 4
    bytes_accessed = act_bytes + n_bblocks * w_bytes + B * H * 4

    out = pl.pallas_call(
        kernel,
        out_shape=jax.ShapeDtypeStruct((B, 1, H), jnp.float32),
        grid=(n_bblocks, NUM_LAYERS),
        in_specs=in_specs,
        out_specs=pl.BlockSpec((BB, 1, H), lambda bi, l: (bi, 0, 0)),
        scratch_shapes=[pltpu.VMEM((BB * S, H), jnp.float32),   # resident hidden state
                        pltpu.VMEM((BB * S, H), jnp.float32)],  # per-layer ctx assembly
        compiler_params=pltpu.CompilerParams(
            dimension_semantics=("parallel", "arbitrary")),
        cost_estimate=pl.CostEstimate(flops=flops,
                                      transcendentals=transcendentals,
                                      bytes_accessed=bytes_accessed),
    )(*inputs)
    return out.reshape(B, H)


# ---------------- pure-JAX reference (per-batch, mirrors PyTorch semantics) ----------------

def reference_forward(params, input_ids, attention_mask, pooling_type="avg"):
    B, S = input_ids.shape
    emb = (jnp.take(params["word_emb"], input_ids, axis=0)
           + params["pos_emb"][:S][None, :, :]
           + params["type_emb"][0][None, None, :])
    hidden = _layernorm(emb, params["emb_ln_g"], params["emb_ln_b"])   # (B, S, H)
    maskf = attention_mask.astype(jnp.float32)

    outs = []
    for b in range(B):
        x = hidden[b]                                                 # (S, H)
        bias = ((1.0 - maskf[b]) * MASK_MIN)[None, :]                 # (1, S)
        for l in range(NUM_LAYERS):
            xb = x.astype(jnp.bfloat16)
            qkv = jnp.dot(xb, params["wqkv"][l],
                          preferred_element_type=jnp.float32) + params["bqkv"][l]
            ctx_heads = []
            for hh in range(NUM_HEADS):
                lo = hh * HEAD_DIM
                qh = qkv[:, lo:lo + HEAD_DIM].astype(jnp.bfloat16)
                kh = qkv[:, H + lo:H + lo + HEAD_DIM].astype(jnp.bfloat16)
                vh = qkv[:, 2 * H + lo:2 * H + lo + HEAD_DIM].astype(jnp.bfloat16)
                # note: 1/sqrt(head_dim) already folded into the Q weights
                s = jnp.dot(qh, kh.T, preferred_element_type=jnp.float32) + bias
                p = jax.nn.softmax(s, axis=-1)
                ctx_heads.append(jnp.dot(p.astype(jnp.bfloat16), vh,
                                         preferred_element_type=jnp.float32))
            ctx = jnp.concatenate(ctx_heads, axis=-1)
            attn = jnp.dot(ctx.astype(jnp.bfloat16), params["wo"][l],
                           preferred_element_type=jnp.float32) + params["bo"][l]
            x1 = _layernorm(attn + x, params["ln1_g"][l], params["ln1_b"][l])
            h1 = jnp.dot(x1.astype(jnp.bfloat16), params["w1"][l],
                         preferred_element_type=jnp.float32) + params["b1"][l]
            h1 = jax.nn.gelu(h1, approximate=True)
            h2 = jnp.dot(h1.astype(jnp.bfloat16), params["w2"][l],
                         preferred_element_type=jnp.float32) + params["b2"][l]
            x = _layernorm(h2 + x1, params["ln2_g"][l], params["ln2_b"][l])
        outs.append(x)
    last = jnp.stack(outs)                                            # (B, S, H)

    if pooling_type == "cls":
        return last[:, 0, :]
    elif pooling_type in ("avg", "average"):
        m = maskf[:, :, None]
        num = jnp.sum(last[:, 1:, :] * m[:, 1:, :], axis=1)
        den = jnp.sum(m[:, 1:, :], axis=1)
        return num / den
    elif pooling_type in ("max", "max_pooling"):
        add = jnp.where(maskf == 0.0, -jnp.inf, 0.0)[:, :, None]
        return jnp.max(last[:, 1:, :] + add[:, 1:, :], axis=1)
    else:
        raise NotImplementedError("Incorrect pooling type for Transformer encoder")


# ----------------------------- deterministic params -----------------------------

def init_params(key):
    def normal(k, shape):
        return 0.02 * jax.random.normal(k, shape, jnp.float32)

    keys = jax.random.split(key, 9)
    # fold the softmax 1/sqrt(head_dim) scale into the Q projection (exact: 1/8)
    wq = normal(keys[3], (NUM_LAYERS, H, H)) * (HEAD_DIM ** -0.5)
    wk = normal(keys[4], (NUM_LAYERS, H, H))
    wv = normal(keys[5], (NUM_LAYERS, H, H))
    wo = normal(keys[6], (NUM_LAYERS, H, H))
    w1 = normal(keys[7], (NUM_LAYERS, H, I))
    w2 = normal(keys[8], (NUM_LAYERS, I, H))
    wqkv = jnp.concatenate([wq, wk, wv], axis=-1)     # (L, H, 3H), head h = cols h*HD:(h+1)*HD

    return {
        "word_emb": normal(keys[0], (VOCAB, H)),
        "pos_emb": normal(keys[1], (MAX_POS, H)),
        "type_emb": normal(keys[2], (TYPE_VOCAB, H)),
        "emb_ln_g": jnp.ones((1, H), jnp.float32),
        "emb_ln_b": jnp.zeros((1, H), jnp.float32),
        # matmul weights in bf16 (MXU fast path, half DMA bytes); elementwise params f32
        "wqkv": wqkv.astype(jnp.bfloat16),
        "bqkv": jnp.zeros((NUM_LAYERS, 1, 3 * H), jnp.float32),
        "wo": wo.astype(jnp.bfloat16),
        "bo": jnp.zeros((NUM_LAYERS, 1, H), jnp.float32),
        "ln1_g": jnp.ones((NUM_LAYERS, 1, H), jnp.float32),
        "ln1_b": jnp.zeros((NUM_LAYERS, 1, H), jnp.float32),
        "w1": w1.astype(jnp.bfloat16),
        "b1": jnp.zeros((NUM_LAYERS, 1, I), jnp.float32),
        "w2": w2.astype(jnp.bfloat16),
        "b2": jnp.zeros((NUM_LAYERS, 1, H), jnp.float32),
        "ln2_g": jnp.ones((NUM_LAYERS, 1, H), jnp.float32),
        "ln2_b": jnp.zeros((NUM_LAYERS, 1, H), jnp.float32),
    }


if __name__ == "__main__":
    key = jax.random.PRNGKey(0)
    pkey, dkey = jax.random.split(key)
    params = init_params(pkey)

    B, S = 2, 8
    input_ids = jax.random.randint(dkey, (B, S), 0, VOCAB, dtype=jnp.int32)
    # batch 1 has two padded positions at the end
    attention_mask = jnp.ones((B, S), dtype=jnp.int32).at[1, 6:].set(0)

    for ptype in ("avg", "max", "cls"):
        out = encoder_bert_forward(params, input_ids, attention_mask, pooling_type=ptype)
        out = jax.block_until_ready(out)
        assert out.shape == (B, H)
        assert bool(jnp.all(jnp.isfinite(out)))
        ref = reference_forward(params, input_ids, attention_mask, pooling_type=ptype)
        max_err = float(jnp.max(jnp.abs(out - ref)))
        assert max_err < 2e-2, f"{ptype} pooling mismatch: max_err={max_err}"

    print("KERNEL_OK")
</pallas_src>

<mosaic_0001>
module attributes {stable_mosaic.version = 11 : i64} {
  func.func @kernel(%arg0: i32, %arg1: i32, %arg2: memref<2x8x128xf32, #tpu.memory_space<vmem>>, %arg3: memref<2x1x8xf32, #tpu.memory_space<vmem>>, %arg4: memref<2x8x1xf32, #tpu.memory_space<vmem>>, %arg5: memref<1x128xf32, #tpu.memory_space<vmem>>, %arg6: memref<1x128xf32, #tpu.memory_space<vmem>>, %arg7: memref<1x128x384xbf16, #tpu.memory_space<vmem>>, %arg8: memref<1x1x384xf32, #tpu.memory_space<vmem>>, %arg9: memref<1x128x128xbf16, #tpu.memory_space<vmem>>, %arg10: memref<1x1x128xf32, #tpu.memory_space<vmem>>, %arg11: memref<1x1x128xf32, #tpu.memory_space<vmem>>, %arg12: memref<1x1x128xf32, #tpu.memory_space<vmem>>, %arg13: memref<1x128x512xbf16, #tpu.memory_space<vmem>>, %arg14: memref<1x1x512xf32, #tpu.memory_space<vmem>>, %arg15: memref<1x512x128xbf16, #tpu.memory_space<vmem>>, %arg16: memref<1x1x128xf32, #tpu.memory_space<vmem>>, %arg17: memref<1x1x128xf32, #tpu.memory_space<vmem>>, %arg18: memref<1x1x128xf32, #tpu.memory_space<vmem>>, %arg19: memref<2x1x128xf32, #tpu.memory_space<vmem>>, %arg20: memref<16x128xf32, #tpu.memory_space<vmem>>, %arg21: memref<16x128xf32, #tpu.memory_space<vmem>>) attributes {dimension_semantics = [#tpu.dimension_semantics<parallel>, #tpu.dimension_semantics<arbitrary>], iteration_bounds = array<i64: 1, 2>, scalar_prefetch = 0 : i64, scratch_operands = 2 : i64, tpu.core_type = #tpu.core_type<tc>, window_params = [{transform_indices = @transform_0, window_bounds = array<i64: 2, 8, 128>}, {transform_indices = @transform_1, window_bounds = array<i64: 2, 1, 8>}, {transform_indices = @transform_2, window_bounds = array<i64: 2, 8, 1>}, {pipeline_mode = #tpu.pipeline_mode<synchronous>, transform_indices = @transform_3, window_bounds = array<i64: 1, 128>}, {pipeline_mode = #tpu.pipeline_mode<synchronous>, transform_indices = @transform_4, window_bounds = array<i64: 1, 128>}, {transform_indices = @transform_5, window_bounds = array<i64: 1, 128, 384>}, {transform_indices = @transform_6, window_bounds = array<i64: 1, 1, 384>}, {transform_indices = @transform_7, window_bounds = array<i64: 1, 128, 128>}, {transform_indices = @transform_8, window_bounds = array<i64: 1, 1, 128>}, {transform_indices = @transform_9, window_bounds = array<i64: 1, 1, 128>}, {transform_indices = @transform_10, window_bounds = array<i64: 1, 1, 128>}, {transform_indices = @transform_11, window_bounds = array<i64: 1, 128, 512>}, {transform_indices = @transform_12, window_bounds = array<i64: 1, 1, 512>}, {transform_indices = @transform_13, window_bounds = array<i64: 1, 512, 128>}, {transform_indices = @transform_14, window_bounds = array<i64: 1, 1, 128>}, {transform_indices = @transform_15, window_bounds = array<i64: 1, 1, 128>}, {transform_indices = @transform_16, window_bounds = array<i64: 1, 1, 128>}, {transform_indices = @transform_17, window_bounds = array<i64: 2, 1, 128>}]} {
    %c0_i32 = arith.constant 0 : i32
    %0 = arith.cmpi eq, %arg1, %c0_i32 : i32
    %1 = arith.extui %0 : i1 to i32
    %c0_i32_0 = arith.constant 0 : i32
    %2 = arith.cmpi ne, %1, %c0_i32_0 : i32
    scf.if %2 {
      %c0_76 = arith.constant 0 : index
      %c0_77 = arith.constant 0 : index
      %c0_78 = arith.constant 0 : index
      %165 = vector.load %arg2[%c0_76, %c0_77, %c0_78] : memref<2x8x128xf32, #tpu.memory_space<vmem>>, vector<2x8x128xf32>
      %166 = vector.shape_cast %165 : vector<2x8x128xf32> to vector<16x128xf32>
      %c0_79 = arith.constant 0 : index
      %c0_80 = arith.constant 0 : index
      %167 = vector.load %arg5[%c0_79, %c0_80] : memref<1x128xf32, #tpu.memory_space<vmem>>, vector<1x128xf32>
      %c0_81 = arith.constant 0 : index
      %c0_82 = arith.constant 0 : index
      %168 = vector.load %arg6[%c0_81, %c0_82] : memref<1x128xf32, #tpu.memory_space<vmem>>, vector<1x128xf32>
      %cst_83 = arith.constant dense<0.000000e+00> : vector<16xf32>
      %169 = vector.multi_reduction <add>, %166, %cst_83 [1] : vector<16x128xf32> to vector<16xf32>
      %170 = vector.shape_cast %169 : vector<16xf32> to vector<16x1xf32>
      %cst_84 = arith.constant 1.280000e+02 : f32
      %171 = vector.broadcast %cst_84 : f32 to vector<16x1xf32>
      %172 = arith.divf %170, %171 : vector<16x1xf32>
      %173 = vector.broadcast %172 : vector<16x1xf32> to vector<16x128xf32>
      %174 = arith.subf %166, %173 : vector<16x128xf32>
      %175 = arith.mulf %174, %174 : vector<16x128xf32>
      %cst_85 = arith.constant dense<0.000000e+00> : vector<16xf32>
      %176 = vector.multi_reduction <add>, %175, %cst_85 [1] : vector<16x128xf32> to vector<16xf32>
      %177 = vector.shape_cast %176 : vector<16xf32> to vector<16x1xf32>
      %cst_86 = arith.constant 1.280000e+02 : f32
      %178 = vector.broadcast %cst_86 : f32 to vector<16x1xf32>
      %179 = arith.divf %177, %178 : vector<16x1xf32>
      %180 = vector.broadcast %172 : vector<16x1xf32> to vector<16x128xf32>
      %181 = arith.subf %166, %180 : vector<16x128xf32>
      %cst_87 = arith.constant 9.99999996E-13 : f32
      %182 = vector.broadcast %cst_87 : f32 to vector<16x1xf32>
      %183 = arith.addf %179, %182 : vector<16x1xf32>
      %184 = math.rsqrt %183 : vector<16x1xf32>
      %185 = vector.broadcast %184 : vector<16x1xf32> to vector<16x128xf32>
      %186 = arith.mulf %181, %185 : vector<16x128xf32>
      %187 = vector.broadcast %167 : vector<1x128xf32> to vector<16x128xf32>
      %188 = arith.mulf %186, %187 : vector<16x128xf32>
      %189 = vector.broadcast %168 : vector<1x128xf32> to vector<16x128xf32>
      %190 = arith.addf %188, %189 : vector<16x128xf32>
      %c0_88 = arith.constant 0 : index
      %c0_89 = arith.constant 0 : index
      %191 = vector.load %arg20[%c0_88, %c0_89] : memref<16x128xf32, #tpu.memory_space<vmem>>, vector<16x128xf32>
      tpu.vector_store %arg20[%c0_88, %c0_89], %190 {strides = array<i32>} : memref<16x128xf32, #tpu.memory_space<vmem>>, vector<16x128xf32>,
    } else {
    }
    %c0 = arith.constant 0 : index
    %c0_1 = arith.constant 0 : index
    %3 = vector.load %arg20[%c0, %c0_1] : memref<16x128xf32, #tpu.memory_space<vmem>>, vector<16x128xf32>
    %4 = arith.truncf %3 : vector<16x128xf32> to vector<16x128xbf16>
    %c0_2 = arith.constant 0 : index
    %c0_3 = arith.constant 0 : index
    %c0_4 = arith.constant 0 : index
    %5 = vector.load %arg3[%c0_2, %c0_3, %c0_4] : memref<2x1x8xf32, #tpu.memory_space<vmem>>, vector<2x1x8xf32>
    %cst = arith.constant 1.000000e+00 : f32
    %6 = vector.broadcast %cst : f32 to vector<2x1x8xf32>
    %7 = arith.subf %6, %5 : vector<2x1x8xf32>
    %cst_5 = arith.constant -1.000000e+09 : f32
    %8 = vector.broadcast %cst_5 : f32 to vector<2x1x8xf32>
    %9 = arith.mulf %7, %8 : vector<2x1x8xf32>
    %c0_6 = arith.constant 0 : index
    %c0_7 = arith.constant 0 : index
    %c0_8 = arith.constant 0 : index
    %10 = vector.load %arg7[%c0_6, %c0_7, %c0_8] : memref<1x128x384xbf16, #tpu.memory_space<vmem>>, vector<1x128x384xbf16>
    %11 = vector.shape_cast %10 : vector<1x128x384xbf16> to vector<128x384xbf16>
    %cst_9 = arith.constant dense<0.000000e+00> : vector<16x384xf32>
    %12 = tpu.matmul %4, %11, %cst_9 {dimension_numbers = #tpu.dot_dimension_numbers<[1], [0], [0], [1], [0, 0, 1, 1], [], []>} : vector<16x128xbf16>, vector<128x384xbf16>, vector<16x384xf32> -> vector<16x384xf32>
    %c0_10 = arith.constant 0 : index
    %c0_11 = arith.constant 0 : index
    %c0_12 = arith.constant 0 : index
    %13 = vector.load %arg8[%c0_10, %c0_11, %c0_12] : memref<1x1x384xf32, #tpu.memory_space<vmem>>, vector<1x1x384xf32>
    %14 = vector.shape_cast %13 : vector<1x1x384xf32> to vector<1x384xf32>
    %15 = vector.broadcast %14 : vector<1x384xf32> to vector<16x384xf32>
    %16 = arith.addf %12, %15 : vector<16x384xf32>
    %17 = vector.extract_strided_slice %16 {offsets = [0, 0], sizes = [16, 128], strides = [1, 1]} : vector<16x384xf32> to vector<16x128xf32>
    %18 = vector.shape_cast %17 : vector<16x128xf32> to vector<2x8x128xf32>
    %19 = vector.extract_strided_slice %16 {offsets = [0, 128], sizes = [16, 128], strides = [1, 1]} : vector<16x384xf32> to vector<16x128xf32>
    %20 = vector.shape_cast %19 : vector<16x128xf32> to vector<2x8x128xf32>
    %21 = vector.extract_strided_slice %16 {offsets = [0, 256], sizes = [16, 128], strides = [1, 1]} : vector<16x384xf32> to vector<16x128xf32>
    %22 = vector.shape_cast %21 : vector<16x128xf32> to vector<2x8x128xf32>
    %23 = vector.extract_strided_slice %18 {offsets = [0, 0, 0], sizes = [2, 8, 64], strides = [1, 1, 1]} : vector<2x8x128xf32> to vector<2x8x64xf32>
    %24 = arith.truncf %23 : vector<2x8x64xf32> to vector<2x8x64xbf16>
    %25 = vector.extract_strided_slice %20 {offsets = [0, 0, 0], sizes = [2, 8, 64], strides = [1, 1, 1]} : vector<2x8x128xf32> to vector<2x8x64xf32>
    %26 = arith.truncf %25 : vector<2x8x64xf32> to vector<2x8x64xbf16>
    %27 = vector.extract_strided_slice %22 {offsets = [0, 0, 0], sizes = [2, 8, 64], strides = [1, 1, 1]} : vector<2x8x128xf32> to vector<2x8x64xf32>
    %28 = arith.truncf %27 : vector<2x8x64xf32> to vector<2x8x64xbf16>
    "tpu.trace_start"() <{level = 10 : i32, message = "bqd,bkd->bqk"}> : () -> ()
    %cst_13 = arith.constant dense<0.000000e+00> : vector<2x8x8xf32>
    %29 = tpu.matmul %24, %26, %cst_13 {dimension_numbers = #tpu.dot_dimension_numbers<[2], [2], [1], [1], [0, 0, 0, 1, 1, 1], [0], [0]>} : vector<2x8x64xbf16>, vector<2x8x64xbf16>, vector<2x8x8xf32> -> vector<2x8x8xf32>
    "tpu.trace_stop"() : () -> ()
    %30 = vector.broadcast %9 : vector<2x1x8xf32> to vector<2x8x8xf32>
    %31 = arith.addf %29, %30 : vector<2x8x8xf32>
    %cst_14 = arith.constant dense<0xFF800000> : vector<2x8xf32>
    %32 = vector.multi_reduction <maximumf>, %31, %cst_14 [2] : vector<2x8x8xf32> to vector<2x8xf32>
    %33 = vector.shape_cast %32 : vector<2x8xf32> to vector<2x8x1xf32>
    %34 = vector.broadcast %33 : vector<2x8x1xf32> to vector<2x8x8xf32>
    %35 = arith.subf %31, %34 : vector<2x8x8xf32>
    %36 = math.exp %35 : vector<2x8x8xf32>
    %cst_15 = arith.constant dense<0.000000e+00> : vector<2x8xf32>
    %37 = vector.multi_reduction <add>, %36, %cst_15 [2] : vector<2x8x8xf32> to vector<2x8xf32>
    %38 = vector.shape_cast %37 : vector<2x8xf32> to vector<2x8x1xf32>
    %39 = tpu.reciprocal %38 {approx = true} : vector<2x8x1xf32> -> vector<2x8x1xf32>
    %40 = vector.broadcast %39 : vector<2x8x1xf32> to vector<2x8x8xf32>
    %41 = arith.mulf %36, %40 : vector<2x8x8xf32>
    %42 = arith.truncf %41 : vector<2x8x8xf32> to vector<2x8x8xbf16>
    "tpu.trace_start"() <{level = 10 : i32, message = "bqk,bkd->bqd"}> : () -> ()
    %cst_16 = arith.constant dense<0.000000e+00> : vector<2x8x64xf32>
    %43 = tpu.matmul %42, %28, %cst_16 {dimension_numbers = #tpu.dot_dimension_numbers<[2], [1], [1], [2], [0, 0, 0, 1, 1, 2], [0], [0]>} : vector<2x8x8xbf16>, vector<2x8x64xbf16>, vector<2x8x64xf32> -> vector<2x8x64xf32>
    "tpu.trace_stop"() : () -> ()
    %44 = vector.shape_cast %43 : vector<2x8x64xf32> to vector<16x64xf32>
    %c0_17 = arith.constant 0 : index
    %c0_18 = arith.constant 0 : index
    %45 = vector.load %arg21[%c0_17, %c0_18] : memref<16x128xf32, #tpu.memory_space<vmem>>, vector<16x64xf32>
    tpu.vector_store %arg21[%c0_17, %c0_18], %44 {strides = array<i32>} : memref<16x128xf32, #tpu.memory_space<vmem>>, vector<16x64xf32>,
    %46 = vector.extract_strided_slice %18 {offsets = [0, 0, 64], sizes = [2, 8, 64], strides = [1, 1, 1]} : vector<2x8x128xf32> to vector<2x8x64xf32>
    %47 = arith.truncf %46 : vector<2x8x64xf32> to vector<2x8x64xbf16>
    %48 = vector.extract_strided_slice %20 {offsets = [0, 0, 64], sizes = [2, 8, 64], strides = [1, 1, 1]} : vector<2x8x128xf32> to vector<2x8x64xf32>
    %49 = arith.truncf %48 : vector<2x8x64xf32> to vector<2x8x64xbf16>
    %50 = vector.extract_strided_slice %22 {offsets = [0, 0, 64], sizes = [2, 8, 64], strides = [1, 1, 1]} : vector<2x8x128xf32> to vector<2x8x64xf32>
    %51 = arith.truncf %50 : vector<2x8x64xf32> to vector<2x8x64xbf16>
    "tpu.trace_start"() <{level = 10 : i32, message = "bqd,bkd->bqk"}> : () -> ()
    %cst_19 = arith.constant dense<0.000000e+00> : vector<2x8x8xf32>
    %52 = tpu.matmul %47, %49, %cst_19 {dimension_numbers = #tpu.dot_dimension_numbers<[2], [2], [1], [1], [0, 0, 0, 1, 1, 1], [0], [0]>} : vector<2x8x64xbf16>, vector<2x8x64xbf16>, vector<2x8x8xf32> -> vector<2x8x8xf32>
    "tpu.trace_stop"() : () -> ()
    %53 = vector.broadcast %9 : vector<2x1x8xf32> to vector<2x8x8xf32>
    %54 = arith.addf %52, %53 : vector<2x8x8xf32>
    %cst_20 = arith.constant dense<0xFF800000> : vector<2x8xf32>
    %55 = vector.multi_reduction <maximumf>, %54, %cst_20 [2] : vector<2x8x8xf32> to vector<2x8xf32>
    %56 = vector.shape_cast %55 : vector<2x8xf32> to vector<2x8x1xf32>
    %57 = vector.broadcast %56 : vector<2x8x1xf32> to vector<2x8x8xf32>
    %58 = arith.subf %54, %57 : vector<2x8x8xf32>
    %59 = math.exp %58 : vector<2x8x8xf32>
    %cst_21 = arith.constant dense<0.000000e+00> : vector<2x8xf32>
    %60 = vector.multi_reduction <add>, %59, %cst_21 [2] : vector<2x8x8xf32> to vector<2x8xf32>
    %61 = vector.shape_cast %60 : vector<2x8xf32> to vector<2x8x1xf32>
    %62 = tpu.reciprocal %61 {approx = true} : vector<2x8x1xf32> -> vector<2x8x1xf32>
    %63 = vector.broadcast %62 : vector<2x8x1xf32> to vector<2x8x8xf32>
    %64 = arith.mulf %59, %63 : vector<2x8x8xf32>
    %65 = arith.truncf %64 : vector<2x8x8xf32> to vector<2x8x8xbf16>
    "tpu.trace_start"() <{level = 10 : i32, message = "bqk,bkd->bqd"}> : () -> ()
    %cst_22 = arith.constant dense<0.000000e+00> : vector<2x8x64xf32>
    %66 = tpu.matmul %65, %51, %cst_22 {dimension_numbers = #tpu.dot_dimension_numbers<[2], [1], [1], [2], [0, 0, 0, 1, 1, 2], [0], [0]>} : vector<2x8x8xbf16>, vector<2x8x64xbf16>, vector<2x8x64xf32> -> vector<2x8x64xf32>
    "tpu.trace_stop"() : () -> ()
    %67 = vector.shape_cast %66 : vector<2x8x64xf32> to vector<16x64xf32>
    %c0_23 = arith.constant 0 : index
    %c64 = arith.constant 64 : index
    %68 = vector.load %arg21[%c0_23, %c64] : memref<16x128xf32, #tpu.memory_space<vmem>>, vector<16x64xf32>
    tpu.vector_store %arg21[%c0_23, %c64], %67 {strides = array<i32>} : memref<16x128xf32, #tpu.memory_space<vmem>>, vector<16x64xf32>,
    %c0_24 = arith.constant 0 : index
    %c0_25 = arith.constant 0 : index
    %69 = vector.load %arg21[%c0_24, %c0_25] : memref<16x128xf32, #tpu.memory_space<vmem>>, vector<16x128xf32>
    %70 = arith.truncf %69 : vector<16x128xf32> to vector<16x128xbf16>
    %c0_26 = arith.constant 0 : index
    %c0_27 = arith.constant 0 : index
    %c0_28 = arith.constant 0 : index
    %71 = vector.load %arg9[%c0_26, %c0_27, %c0_28] : memref<1x128x128xbf16, #tpu.memory_space<vmem>>, vector<1x128x128xbf16>
    %72 = vector.shape_cast %71 : vector<1x128x128xbf16> to vector<128x128xbf16>
    %cst_29 = arith.constant dense<0.000000e+00> : vector<16x128xf32>
    %73 = tpu.matmul %70, %72, %cst_29 {dimension_numbers = #tpu.dot_dimension_numbers<[1], [0], [0], [1], [0, 0, 1, 1], [], []>} : vector<16x128xbf16>, vector<128x128xbf16>, vector<16x128xf32> -> vector<16x128xf32>
    %c0_30 = arith.constant 0 : index
    %c0_31 = arith.constant 0 : index
    %c0_32 = arith.constant 0 : index
    %74 = vector.load %arg10[%c0_30, %c0_31, %c0_32] : memref<1x1x128xf32, #tpu.memory_space<vmem>>, vector<1x1x128xf32>
    %75 = vector.shape_cast %74 : vector<1x1x128xf32> to vector<1x128xf32>
    %76 = vector.broadcast %75 : vector<1x128xf32> to vector<16x128xf32>
    %77 = arith.addf %73, %76 : vector<16x128xf32>
    %78 = arith.addf %77, %3 : vector<16x128xf32>
    %c0_33 = arith.constant 0 : index
    %c0_34 = arith.constant 0 : index
    %c0_35 = arith.constant 0 : index
    %79 = vector.load %arg11[%c0_33, %c0_34, %c0_35] : memref<1x1x128xf32, #tpu.memory_space<vmem>>, vector<1x1x128xf32>
    %80 = vector.shape_cast %79 : vector<1x1x128xf32> to vector<1x128xf32>
    %c0_36 = arith.constant 0 : index
    %c0_37 = arith.constant 0 : index
    %c0_38 = arith.constant 0 : index
    %81 = vector.load %arg12[%c0_36, %c0_37, %c0_38] : memref<1x1x128xf32, #tpu.memory_space<vmem>>, vector<1x1x128xf32>
    %82 = vector.shape_cast %81 : vector<1x1x128xf32> to vector<1x128xf32>
    %cst_39 = arith.constant dense<0.000000e+00> : vector<16xf32>
    %83 = vector.multi_reduction <add>, %78, %cst_39 [1] : vector<16x128xf32> to vector<16xf32>
    %84 = vector.shape_cast %83 : vector<16xf32> to vector<16x1xf32>
    %cst_40 = arith.constant 1.280000e+02 : f32
    %85 = vector.broadcast %cst_40 : f32 to vector<16x1xf32>
    %86 = arith.divf %84, %85 : vector<16x1xf32>
    %87 = vector.broadcast %86 : vector<16x1xf32> to vector<16x128xf32>
    %88 = arith.subf %78, %87 : vector<16x128xf32>
    %89 = arith.mulf %88, %88 : vector<16x128xf32>
    %cst_41 = arith.constant dense<0.000000e+00> : vector<16xf32>
    %90 = vector.multi_reduction <add>, %89, %cst_41 [1] : vector<16x128xf32> to vector<16xf32>
    %91 = vector.shape_cast %90 : vector<16xf32> to vector<16x1xf32>
    %cst_42 = arith.constant 1.280000e+02 : f32
    %92 = vector.broadcast %cst_42 : f32 to vector<16x1xf32>
    %93 = arith.divf %91, %92 : vector<16x1xf32>
    %94 = vector.broadcast %86 : vector<16x1xf32> to vector<16x128xf32>
    %95 = arith.subf %78, %94 : vector<16x128xf32>
    %cst_43 = arith.constant 9.99999996E-13 : f32
    %96 = vector.broadcast %cst_43 : f32 to vector<16x1xf32>
    %97 = arith.addf %93, %96 : vector<16x1xf32>
    %98 = math.rsqrt %97 : vector<16x1xf32>
    %99 = vector.broadcast %98 : vector<16x1xf32> to vector<16x128xf32>
    %100 = arith.mulf %95, %99 : vector<16x128xf32>
    %101 = vector.broadcast %80 : vector<1x128xf32> to vector<16x128xf32>
    %102 = arith.mulf %100, %101 : vector<16x128xf32>
    %103 = vector.broadcast %82 : vector<1x128xf32> to vector<16x128xf32>
    %104 = arith.addf %102, %103 : vector<16x128xf32>
    %105 = arith.truncf %104 : vector<16x128xf32> to vector<16x128xbf16>
    %c0_44 = arith.constant 0 : index
    %c0_45 = arith.constant 0 : index
    %c0_46 = arith.constant 0 : index
    %106 = vector.load %arg13[%c0_44, %c0_45, %c0_46] : memref<1x128x512xbf16, #tpu.memory_space<vmem>>, vector<1x128x512xbf16>
    %107 = vector.shape_cast %106 : vector<1x128x512xbf16> to vector<128x512xbf16>
    %cst_47 = arith.constant dense<0.000000e+00> : vector<16x512xf32>
    %108 = tpu.matmul %105, %107, %cst_47 {dimension_numbers = #tpu.dot_dimension_numbers<[1], [0], [0], [1], [0, 0, 1, 1], [], []>} : vector<16x128xbf16>, vector<128x512xbf16>, vector<16x512xf32> -> vector<16x512xf32>
    %c0_48 = arith.constant 0 : index
    %c0_49 = arith.constant 0 : index
    %c0_50 = arith.constant 0 : index
    %109 = vector.load %arg14[%c0_48, %c0_49, %c0_50] : memref<1x1x512xf32, #tpu.memory_space<vmem>>, vector<1x1x512xf32>
    %110 = vector.shape_cast %109 : vector<1x1x512xf32> to vector<1x512xf32>
    %111 = vector.broadcast %110 : vector<1x512xf32> to vector<16x512xf32>
    %112 = arith.addf %108, %111 : vector<16x512xf32>
    %113 = arith.mulf %112, %112 : vector<16x512xf32>
    %114 = arith.mulf %112, %113 : vector<16x512xf32>
    %cst_51 = arith.constant 4.471500e-02 : f32
    %115 = vector.broadcast %cst_51 : f32 to vector<16x512xf32>
    %116 = arith.mulf %115, %114 : vector<16x512xf32>
    %117 = arith.addf %112, %116 : vector<16x512xf32>
    %cst_52 = arith.constant 0.797884583 : f32
    %118 = vector.broadcast %cst_52 : f32 to vector<16x512xf32>
    %119 = arith.mulf %118, %117 : vector<16x512xf32>
    %120 = math.tanh %119 : vector<16x512xf32>
    %cst_53 = arith.constant 1.000000e+00 : f32
    %121 = vector.broadcast %cst_53 : f32 to vector<16x512xf32>
    %122 = arith.addf %121, %120 : vector<16x512xf32>
    %cst_54 = arith.constant 5.000000e-01 : f32
    %123 = vector.broadcast %cst_54 : f32 to vector<16x512xf32>
    %124 = arith.mulf %123, %122 : vector<16x512xf32>
    %125 = arith.mulf %112, %124 : vector<16x512xf32>
    %126 = arith.truncf %125 : vector<16x512xf32> to vector<16x512xbf16>
    %c0_55 = arith.constant 0 : index
    %c0_56 = arith.constant 0 : index
    %c0_57 = arith.constant 0 : index
    %127 = vector.load %arg15[%c0_55, %c0_56, %c0_57] : memref<1x512x128xbf16, #tpu.memory_space<vmem>>, vector<1x512x128xbf16>
    %128 = vector.shape_cast %127 : vector<1x512x128xbf16> to vector<512x128xbf16>
    %cst_58 = arith.constant dense<0.000000e+00> : vector<16x128xf32>
    %129 = tpu.matmul %126, %128, %cst_58 {dimension_numbers = #tpu.dot_dimension_numbers<[1], [0], [0], [1], [0, 0, 1, 1], [], []>} : vector<16x512xbf16>, vector<512x128xbf16>, vector<16x128xf32> -> vector<16x128xf32>
    %c0_59 = arith.constant 0 : index
    %c0_60 = arith.constant 0 : index
    %c0_61 = arith.constant 0 : index
    %130 = vector.load %arg16[%c0_59, %c0_60, %c0_61] : memref<1x1x128xf32, #tpu.memory_space<vmem>>, vector<1x1x128xf32>
    %131 = vector.shape_cast %130 : vector<1x1x128xf32> to vector<1x128xf32>
    %132 = vector.broadcast %131 : vector<1x128xf32> to vector<16x128xf32>
    %133 = arith.addf %129, %132 : vector<16x128xf32>
    %134 = arith.addf %133, %104 : vector<16x128xf32>
    %c0_62 = arith.constant 0 : index
    %c0_63 = arith.constant 0 : index
    %c0_64 = arith.constant 0 : index
    %135 = vector.load %arg17[%c0_62, %c0_63, %c0_64] : memref<1x1x128xf32, #tpu.memory_space<vmem>>, vector<1x1x128xf32>
    %136 = vector.shape_cast %135 : vector<1x1x128xf32> to vector<1x128xf32>
    %c0_65 = arith.constant 0 : index
    %c0_66 = arith.constant 0 : index
    %c0_67 = arith.constant 0 : index
    %137 = vector.load %arg18[%c0_65, %c0_66, %c0_67] : memref<1x1x128xf32, #tpu.memory_space<vmem>>, vector<1x1x128xf32>
    %138 = vector.shape_cast %137 : vector<1x1x128xf32> to vector<1x128xf32>
    %cst_68 = arith.constant dense<0.000000e+00> : vector<16xf32>
    %139 = vector.multi_reduction <add>, %134, %cst_68 [1] : vector<16x128xf32> to vector<16xf32>
    %140 = vector.shape_cast %139 : vector<16xf32> to vector<16x1xf32>
    %cst_69 = arith.constant 1.280000e+02 : f32
    %141 = vector.broadcast %cst_69 : f32 to vector<16x1xf32>
    %142 = arith.divf %140, %141 : vector<16x1xf32>
    %143 = vector.broadcast %142 : vector<16x1xf32> to vector<16x128xf32>
    %144 = arith.subf %134, %143 : vector<16x128xf32>
    %145 = arith.mulf %144, %144 : vector<16x128xf32>
    %cst_70 = arith.constant dense<0.000000e+00> : vector<16xf32>
    %146 = vector.multi_reduction <add>, %145, %cst_70 [1] : vector<16x128xf32> to vector<16xf32>
    %147 = vector.shape_cast %146 : vector<16xf32> to vector<16x1xf32>
    %cst_71 = arith.constant 1.280000e+02 : f32
    %148 = vector.broadcast %cst_71 : f32 to vector<16x1xf32>
    %149 = arith.divf %147, %148 : vector<16x1xf32>
    %150 = vector.broadcast %142 : vector<16x1xf32> to vector<16x128xf32>
    %151 = arith.subf %134, %150 : vector<16x128xf32>
    %cst_72 = arith.constant 9.99999996E-13 : f32
    %152 = vector.broadcast %cst_72 : f32 to vector<16x1xf32>
    %153 = arith.addf %149, %152 : vector<16x1xf32>
    %154 = math.rsqrt %153 : vector<16x1xf32>
    %155 = vector.broadcast %154 : vector<16x1xf32> to vector<16x128xf32>
    %156 = arith.mulf %151, %155 : vector<16x128xf32>
    %157 = vector.broadcast %136 : vector<1x128xf32> to vector<16x128xf32>
    %158 = arith.mulf %156, %157 : vector<16x128xf32>
    %159 = vector.broadcast %138 : vector<1x128xf32> to vector<16x128xf32>
    %160 = arith.addf %158, %159 : vector<16x128xf32>
    %c0_73 = arith.constant 0 : index
    %c0_74 = arith.constant 0 : index
    %161 = vector.load %arg20[%c0_73, %c0_74] : memref<16x128xf32, #tpu.memory_space<vmem>>, vector<16x128xf32>
    tpu.vector_store %arg20[%c0_73, %c0_74], %160 {strides = array<i32>} : memref<16x128xf32, #tpu.memory_space<vmem>>, vector<16x128xf32>,
    %c1_i32 = arith.constant 1 : i32
    %162 = arith.cmpi eq, %arg1, %c1_i32 : i32
    %163 = arith.extui %162 : i1 to i32
    %c0_i32_75 = arith.constant 0 : i32
    %164 = arith.cmpi ne, %163, %c0_i32_75 : i32
    scf.if %164 {
      %165 = vector.shape_cast %160 : vector<16x128xf32> to vector<2x8x128xf32>
      %c0_76 = arith.constant 0 : index
      %c0_77 = arith.constant 0 : index
      %c0_78 = arith.constant 0 : index
      %166 = vector.load %arg4[%c0_76, %c0_77, %c0_78] : memref<2x8x1xf32, #tpu.memory_space<vmem>>, vector<2x8x1xf32>
      %167 = vector.broadcast %166 : vector<2x8x1xf32> to vector<2x8x128xf32>
      %168 = arith.mulf %165, %167 : vector<2x8x128xf32>
      %cst_79 = arith.constant dense<0.000000e+00> : vector<2x128xf32>
      %169 = vector.multi_reduction <add>, %168, %cst_79 [1] : vector<2x8x128xf32> to vector<2x128xf32>
      %170 = vector.shape_cast %169 : vector<2x128xf32> to vector<2x1x128xf32>
      %cst_80 = arith.constant dense<0.000000e+00> : vector<2x1xf32>
      %171 = vector.multi_reduction <add>, %166, %cst_80 [1] : vector<2x8x1xf32> to vector<2x1xf32>
      %172 = vector.shape_cast %171 : vector<2x1xf32> to vector<2x1x1xf32>
      %173 = tpu.reciprocal %172 {approx = true} : vector<2x1x1xf32> -> vector<2x1x1xf32>
      %174 = vector.broadcast %173 : vector<2x1x1xf32> to vector<2x1x128xf32>
      %175 = arith.mulf %170, %174 : vector<2x1x128xf32>
      %c0_81 = arith.constant 0 : index
      %c0_82 = arith.constant 0 : index
      %c0_83 = arith.constant 0 : index
      %176 = vector.load %arg19[%c0_81, %c0_82, %c0_83] : memref<2x1x128xf32, #tpu.memory_space<vmem>>, vector<2x1x128xf32>
      tpu.vector_store %arg19[%c0_81, %c0_82, %c0_83], %175 {strides = array<i32>} : memref<2x1x128xf32, #tpu.memory_space<vmem>>, vector<2x1x128xf32>,
    } else {
    }
    return
  }
  func.func @transform_0(%arg0: i32, %arg1: i32) -> (i32, i32, i32) {
    %c0_i32 = arith.constant 0 : i32
    %c0_i32_0 = arith.constant 0 : i32
    %c0_i32_1 = arith.constant 0 : i32
    return %arg0, %c0_i32, %c0_i32_0 : i32, i32, i32
  }
  func.func @transform_1(%arg0: i32, %arg1: i32) -> (i32, i32, i32) {
    %c0_i32 = arith.constant 0 : i32
    %c0_i32_0 = arith.constant 0 : i32
    %c0_i32_1 = arith.constant 0 : i32
    return %arg0, %c0_i32, %c0_i32_0 : i32, i32, i32
  }
  func.func @transform_2(%arg0: i32, %arg1: i32) -> (i32, i32, i32) {
    %c0_i32 = arith.constant 0 : i32
    %c0_i32_0 = arith.constant 0 : i32
    %c0_i32_1 = arith.constant 0 : i32
    return %arg0, %c0_i32, %c0_i32_0 : i32, i32, i32
  }
  func.func @transform_3(%arg0: i32, %arg1: i32) -> (i32, i32) {
    %c0_i32 = arith.constant 0 : i32
    %c0_i32_0 = arith.constant 0 : i32
    %c0_i32_1 = arith.constant 0 : i32
    return %c0_i32, %c0_i32_0 : i32, i32
  }
  func.func @transform_4(%arg0: i32, %arg1: i32) -> (i32, i32) {
    %c0_i32 = arith.constant 0 : i32
    %c0_i32_0 = arith.constant 0 : i32
    %c0_i32_1 = arith.constant 0 : i32
    return %c0_i32, %c0_i32_0 : i32, i32
  }
  func.func @transform_5(%arg0: i32, %arg1: i32) -> (i32, i32, i32) {
    %c0_i32 = arith.constant 0 : i32
    %c0_i32_0 = arith.constant 0 : i32
    %c0_i32_1 = arith.constant 0 : i32
    return %arg1, %c0_i32, %c0_i32_0 : i32, i32, i32
  }
  func.func @transform_6(%arg0: i32, %arg1: i32) -> (i32, i32, i32) {
    %c0_i32 = arith.constant 0 : i32
    %c0_i32_0 = arith.constant 0 : i32
    %c0_i32_1 = arith.constant 0 : i32
    return %arg1, %c0_i32, %c0_i32_0 : i32, i32, i32
  }
  func.func @transform_7(%arg0: i32, %arg1: i32) -> (i32, i32, i32) {
    %c0_i32 = arith.constant 0 : i32
    %c0_i32_0 = arith.constant 0 : i32
    %c0_i32_1 = arith.constant 0 : i32
    return %arg1, %c0_i32, %c0_i32_0 : i32, i32, i32
  }
  func.func @transform_8(%arg0: i32, %arg1: i32) -> (i32, i32, i32) {
    %c0_i32 = arith.constant 0 : i32
    %c0_i32_0 = arith.constant 0 : i32
    %c0_i32_1 = arith.constant 0 : i32
    return %arg1, %c0_i32, %c0_i32_0 : i32, i32, i32
  }
  func.func @transform_9(%arg0: i32, %arg1: i32) -> (i32, i32, i32) {
    %c0_i32 = arith.constant 0 : i32
    %c0_i32_0 = arith.constant 0 : i32
    %c0_i32_1 = arith.constant 0 : i32
    return %arg1, %c0_i32, %c0_i32_0 : i32, i32, i32
  }
  func.func @transform_10(%arg0: i32, %arg1: i32) -> (i32, i32, i32) {
    %c0_i32 = arith.constant 0 : i32
    %c0_i32_0 = arith.constant 0 : i32
    %c0_i32_1 = arith.constant 0 : i32
    return %arg1, %c0_i32, %c0_i32_0 : i32, i32, i32
  }
  func.func @transform_11(%arg0: i32, %arg1: i32) -> (i32, i32, i32) {
    %c0_i32 = arith.constant 0 : i32
    %c0_i32_0 = arith.constant 0 : i32
    %c0_i32_1 = arith.constant 0 : i32
    return %arg1, %c0_i32, %c0_i32_0 : i32, i32, i32
  }
  func.func @transform_12(%arg0: i32, %arg1: i32) -> (i32, i32, i32) {
    %c0_i32 = arith.constant 0 : i32
    %c0_i32_0 = arith.constant 0 : i32
    %c0_i32_1 = arith.constant 0 : i32
    return %arg1, %c0_i32, %c0_i32_0 : i32, i32, i32
  }
  func.func @transform_13(%arg0: i32, %arg1: i32) -> (i32, i32, i32) {
    %c0_i32 = arith.constant 0 : i32
    %c0_i32_0 = arith.constant 0 : i32
    %c0_i32_1 = arith.constant 0 : i32
    return %arg1, %c0_i32, %c0_i32_0 : i32, i32, i32
  }
  func.func @transform_14(%arg0: i32, %arg1: i32) -> (i32, i32, i32) {
    %c0_i32 = arith.constant 0 : i32
    %c0_i32_0 = arith.constant 0 : i32
    %c0_i32_1 = arith.constant 0 : i32
    return %arg1, %c0_i32, %c0_i32_0 : i32, i32, i32
  }
  func.func @transform_15(%arg0: i32, %arg1: i32) -> (i32, i32, i32) {
    %c0_i32 = arith.constant 0 : i32
    %c0_i32_0 = arith.constant 0 : i32
    %c0_i32_1 = arith.constant 0 : i32
    return %arg1, %c0_i32, %c0_i32_0 : i32, i32, i32
  }
  func.func @transform_16(%arg0: i32, %arg1: i32) -> (i32, i32, i32) {
    %c0_i32 = arith.constant 0 : i32
    %c0_i32_0 = arith.constant 0 : i32
    %c0_i32_1 = arith.constant 0 : i32
    return %arg1, %c0_i32, %c0_i32_0 : i32, i32, i32
  }
  func.func @transform_17(%arg0: i32, %arg1: i32) -> (i32, i32, i32) {
    %c0_i32 = arith.constant 0 : i32
    %c0_i32_0 = arith.constant 0 : i32
    %c0_i32_1 = arith.constant 0 : i32
    return %arg0, %c0_i32, %c0_i32_0 : i32, i32, i32
  }
}

</mosaic_0001>

<bundles_post_ra>
// kernel: tpu_custom_call.1
= control target key start
LH: loop header
LB: loop body
LE: loop exit
PB: predicated region body
PF: predicated region fallthrough
CT: control target
= control target key end

     0   :  { %s4654_s0 = inlined_call_operand.vmem [shape: f32[2,8,128], index: 0, kind: input, shape index: {}]   ;;  %s4655_s1 = inlined_call_operand.hbm [shape: f32[2,1,8], index: 1, kind: input, shape index: {}]   ;;  %s4656_s2 = inlined_call_operand.vmem [shape: f32[2,8,1], index: 2, kind: input, shape index: {}]   ;;  %s4657_s3 = inlined_call_operand.hbm [shape: f32[1,128], index: 3, kind: input, shape index: {}]   ;;  %s4658_s4 = inlined_call_operand.hbm [shape: f32[1,128], index: 4, kind: input, shape index: {}]   ;;  %s4659_s5 = inlined_call_operand.hbm [shape: bf16[2,128,384], index: 5, kind: input, shape index: {}]   ;;  %s4660_s6 = inlined_call_operand.hbm [shape: f32[2,1,384], index: 6, kind: input, shape index: {}]   ;;  %s4661_s7 = inlined_call_operand.hbm [shape: bf16[2,128,128], index: 7, kind: input, shape index: {}]   ;;  %s4662_s8 = inlined_call_operand.vmem [shape: f32[2,1,128], index: 8, kind: input, shape index: {}]   ;;  %s4663_s9 = inlined_call_operand.vmem [shape: f32[2,1,128], index: 9, kind: input, shape index: {}]   ;;  %s4664_s10 = inlined_call_operand.vmem [shape: f32[2,1,128], index: 10, kind: input, shape index: {}]   ;;  %s4665_s11 = inlined_call_operand.hbm [shape: bf16[2,128,512], index: 11, kind: input, shape index: {}]   ;;  %s4666_s12 = inlined_call_operand.vmem [shape: f32[2,1,512], index: 12, kind: input, shape index: {}]   ;;  %s4667_s13 = inlined_call_operand.hbm [shape: bf16[2,512,128], index: 13, kind: input, shape index: {}]   ;;  %s4668_s14 = inlined_call_operand.vmem [shape: f32[2,1,128], index: 14, kind: input, shape index: {}]   ;;  %s4669_s15 = inlined_call_operand.vmem [shape: f32[2,1,128], index: 15, kind: input, shape index: {}]   ;;  %s4670_s16 = inlined_call_operand.vmem [shape: f32[2,1,128], index: 16, kind: input, shape index: {}]   ;;  %s4671_s17 = inlined_call_operand.hbm [shape: f32[2,1,128], index: 17, kind: output, shape index: {}]  }
   0x1   :  { %4682 = sst [smem:[#allocation31_spill]] %s4654_s0 }
   0x2   :  { %4683 = sst [smem:[#allocation32_spill]] %s4655_s1 }
   0x3   :  { %4684 = sst [smem:[#allocation33_spill]] %s4656_s2 }
   0x4   :  { %4685 = sst [smem:[#allocation34_spill]] %s4657_s3 }
   0x5   :  { %4686 = sst [smem:[#allocation35_spill]] %s4658_s4 }
   0x6   :  { %4687 = sst [smem:[#allocation36_spill]] %s4659_s5 }
   0x7   :  { %4688 = sst [smem:[#allocation37_spill]] %s4660_s6 }
   0x8   :  { %4689 = sst [smem:[#allocation38_spill]] %s4661_s7 }
   0x9   :  { %4690 = sst [smem:[#allocation39_spill]] %s4662_s8 }
   0xa   :  { %4691 = sst [smem:[#allocation40_spill]] %s4663_s9 }
   0xb   :  { %4692 = sst [smem:[#allocation41_spill]] %s4664_s10 }
   0xc   :  { %4693 = sst [smem:[#allocation42_spill]] %s4665_s11 }
   0xd   :  { %4694 = sst [smem:[#allocation43_spill]] %s4666_s12 }
   0xe   :  { %4695 = sst [smem:[#allocation44_spill]] %s4667_s13 }
   0xf   :  { %4696 = sst [smem:[#allocation45_spill]] %s4668_s14 }
  0x10   :  { %4697 = sst [smem:[#allocation46_spill]] %s4669_s15 }
  0x11   :  { %4698 = sst [smem:[#allocation47_spill]] %s4670_s16 }
  0x12   :  { %4699 = sst [smem:[#allocation48_spill]] %s4671_s17 }
  0x13   :  { %22 = vsyncpa [#allocation5], 0 }
  0x14   :  { %23 = vsyncpa [#allocation8], 0 }
  0x15   :  { %24 = vsyncpa [#allocation11], 0 }
  0x16   :  { %26 = vsyncpa [#allocation11 + $0x1], 0 }
  0x17   :  { %27 = vsyncpa [#allocation14], 0 }
  0x18   :  { %29 = vsyncpa [#allocation14 + $0x1], 0 }
  0x19   :  { %30 = vsyncpa [#allocation17], 0 }
  0x1a   :  { %32 = vsyncpa [#allocation17 + $0x1], 0 }
  0x1b   :  { %33 = vsyncpa [#allocation6], 0  ;;  %s4024_s24 = smov 0   ;;  %s4026_s25 = smov 0  }
  0x1c   :  { %s4028_s26 = smov 0   ;;  %s4030_s27 = smov 0  }
  0x1d   :  { %s4032_s28 = smov 0   ;;  %s4034_s29 = smov 0  }
  0x1e LB: > { %4700 = sst [smem:[#allocation25_spill]] %s3897_s26  ;;  %s4053_s0 = sadd.s32 4294967295, %s3909_s29   ;;  %s3909_s29 = sphi %s4034_s29, %s39_s29   ;;  %s3905_s28 = sphi %s4032_s28, %s4754_s28   ;;  %s3901_s27 = sphi %s4030_s27, %s4753_s27   ;;  %s3897_s26 = sphi %s4028_s26, %s4752_s26   ;;  %s3893_s25 = sphi %s4026_s25, %s4756_s25   ;;  %s3889_s24 = sphi %s4024_s24, %s4755_s24  }
  0x1f   : > { %4701 = sst [smem:[#allocation26_spill]] %s3901_s27  ;;  %p185_p0 = scmp.ne.s32.totalorder %s3897_s26, %s3893_s25 }
  0x20   : > { %4702 = sst [smem:[#allocation27_spill]] %s3905_s28  ;;  %p186_p1 = scmp.eq.s32.totalorder %s3909_s29, 0 }
  0x21   : > { %p191_p2 = scmp.ne.s32.totalorder %s3893_s25, %s3889_s24  ;;  %p4673_p3 = scmp.eq.s32.totalorder %s4053_s0, 0 }
  0x22   : > { %p4061_p4 = por %p186_p1, %p185_p0  ;;  %p2981_p5 = scmp.ge.s32.totalorder %s3909_s29, 1 }
  0x23   : > { %p4068_p6 = por %p4673_p3, %p191_p2  ;;  %p514_p7 = scmp.lt.s32.totalorder %s3909_s29, 3 }
  0x24   : > { %s3911_s20 = smov [#allocation7]   ;;  %p3355_p10 = scmp.lt.s32.totalorder %s3909_s29, 2 }
  0x25   : > { %s4704_s19 = scalar_select %p4068_p6, 1, 0 }
  0x26   : > { %p4073_p8 = pnand %p2981_p5, %p514_p7  ;;  %s561_s21 = sshll.u32 %s3911_s20, 4  ;;  %s562_s21 = int_to_ptr.vmem [resolvable:$true] %s561_s21 }
  0x27   : > { %4705 = sst [smem:[#allocation28_spill]] %s4704_s19  ;;  %s48_s23 = sadd.s32 1, %s3905_s28 }
  0x28   : > { %p3326_p9 = pneg %p4073_p8  ;;  %p4087_p12 = scmp.ge.s32.totalorder %s48_s23, 2 }
  0x29   : > { %s3608_s20 = scalar_lea.vmem %s562_s21, 16  ;;  %s3615_s17 = scalar_lea.vmem %s562_s21, 32 }
  0x2a   : > { %p4082_p11 = pnand %p3326_p9, %p4673_p3  ;;  %p3609_p0 = scmp.ne.s32.totalorder %s562_s21, %s3608_s20 }
  0x2b   : > { %p3616_p5 = scmp.lt.s32.totalorder %s562_s21, %s562_s21  ;;  %p3617_p7 = scmp.lt.s32.totalorder %s3615_s17, %s3608_s20 }
  0x2c   : > { %p3599_p13 = pneg %p4082_p11 }
  0x2d   : > { %p3618_p9 = por %p3617_p7, %p3616_p5 }
  0x2e   : > { %p3611_p1 = pnand %p3609_p0, %p3599_p13 }
  0x30   : > { %p3612_p2 = pneg %p3611_p1 }
  0x32   : > { %p3619_p3 = pnand %p3618_p9, %p3612_p2 }
  0x34   : > { %3622 = shalt.err (!%p3619_p3)
}
  0x35   : > { %s4709_s3 = sld [smem:[#allocation34_spill]]  ;;  %s4758_s23 = smov (%p4087_p12, %s48_s23), 0 }
  0x36   : > { %4710 = sst [smem:[#allocation29_spill]] %s4758_s23  ;;  %s4107_s17 = sand.u32 1, %s3897_s26  }
  0x37   : > { %s3295_s20 = smul.u32 3072, %s3905_s28  ;;  %s175_s30 = ssub.s32 %s3905_s28, %s4758_s23 }
  0x38   : > { %s3294_s2 = smul.u32 192, %s4107_s17  ;;  %p176_p3 = scmp.eq.s32.totalorder %s175_s30, 0 }
  0x39   : > { %s4711_s5 = sld [smem:[#allocation36_spill]]  ;;  %p4120_p0 = pnand %p3355_p10, %p4061_p4 }
  0x3a   : > { %s4715_s23 = sand.u32 1, %s3909_s29   ;;  %s3912_s18 = smov [#allocation10]  }
  0x3b   : > { %3332 = dma.hbm_to_vmem [thread:$0]  (!%p4082_p11), %s4709_s3, 16, %s562_s21, [#allocation8]  }
  0x3c   : > { %s4713_s21 = sadd.s32 1, %s3897_s26  ;;  %s587_s3 = scalar_lea.vmem [#allocation10], %s3294_s2 }
  0x3d   : > { %s4127_s24 = scalar_select %p176_p3, %s3897_s26, %s4713_s21  }
  0x3e   : > { %s594_s10 = sshll.u32 %s587_s3, 4  ;;  %s4131_s9 = scalar_lea.sflag [#allocation11], %s4715_s23  ;;  %s595_s10 = int_to_ptr.vmem [resolvable:$true] %s594_s10 }
  0x3f   : > { %s593_s14 = scalar_lea.hbm %s4711_s5, %s3295_s20  ;;  %4714 = sst [smem:[#allocation30_spill]] %s4127_s24 }
  0x40   : > { %p4135_p12 = pneg %p4120_p0  ;;  %s3636_s30 = scalar_lea.vmem %s595_s10, 3072 }
  0x41   : > { %p3637_p4 = scmp.ne.s32.totalorder %s595_s10, %s3636_s30  ;;  %s3641_s20 = sshll.u32 %s3912_s18, 4  ;;  %s3642_s20 = int_to_ptr.vmem [resolvable:$false] %s3641_s20 }
  0x42   : > { %s3643_s2 = scalar_lea.vmem %s3642_s20, 6144  ;;  %p3644_p2 = scmp.lt.s32.totalorder %s595_s10, %s3642_s20 }
  0x43   : > { %p3639_p10 = pnand %p3637_p4, %p4135_p12  ;;  %p3645_p5 = scmp.lt.s32.totalorder %s3643_s2, %s3636_s30 }
  0x45   : > { %p3640_p1 = pneg %p3639_p10  ;;  %p3646_p7 = por %p3645_p5, %p3644_p2 }
  0x47   : > { %p3647_p9 = pnand %p3646_p7, %p3640_p1 }
  0x49   : > { %3650 = shalt.err (!%p3647_p9)
}
  0x4a   : > { %s3913_s3 = smov 192   ;;  %s3914_s23 = smov 12  }
  0x4b   : > { %3339 = dma.hbm_to_vmem [thread:$0]  (!%p4120_p0), %s593_s14, 3072, %s595_s10, %s4131_s9, %s3913_s3, %s3913_s3, %s3914_s23  }
  0x4c   : > { %s2990_s16 = sshll.u32 %s4107_s17, 6  ;;  %s3125_s21 = sshll.u32 %s3905_s28, 10 }
  0x4d   : > { %s4717_s7 = sld [smem:[#allocation38_spill]]  ;;  %s627_s30 = scalar_lea.vmem [#allocation13], %s2990_s16 }
  0x4e   : > { %s634_s2 = sshll.u32 %s627_s30, 4  ;;  %s4718_s24 = sand.u32 1, %s3909_s29   ;;  %s635_s2 = int_to_ptr.vmem [resolvable:$true] %s634_s2 }
  0x4f   : > { %s4151_s26 = scalar_lea.sflag [#allocation14], %s4718_s24  ;;  %s3664_s8 = scalar_lea.vmem %s635_s2, 1024 }
  0x50   : > { %p3665_p3 = scmp.ne.s32.totalorder %s635_s2, %s3664_s8  ;;  %s3915_s27 = smov [#allocation13]  }
  0x51   : > { %s3669_s19 = sshll.u32 %s3915_s27, 4  ;;  %s3670_s19 = int_to_ptr.vmem [resolvable:$false] %s3669_s19 }
  0x52   : > { %p3667_p4 = pnand %p3665_p3, %p4135_p12  ;;  %s3671_s10 = scalar_lea.vmem %s3670_s19, 2048 }
  0x53   : > { %s633_s20 = scalar_lea.hbm %s4717_s7, %s3125_s21  ;;  %p3672_p1 = scmp.lt.s32.totalorder %s635_s2, %s3670_s19 }
  0x54   : > { %p3668_p10 = pneg %p3667_p4  ;;  %p3673_p2 = scmp.lt.s32.totalorder %s3671_s10, %s3664_s8 }
  0x56   : > { %p3674_p5 = por %p3673_p2, %p3672_p1 }
  0x58   : > { %p3675_p7 = pnand %p3674_p5, %p3668_p10 }
  0x5a   : > { %3678 = shalt.err (!%p3675_p7)
}
  0x5b   : > { %s4680_s5 = smov 64   ;;  %s3917_s14 = smov 4  }
  0x5c   : > { %3345 = dma.hbm_to_vmem [thread:$0]  (!%p4120_p0), %s633_s20, 1024, %s635_s2, %s4151_s26, %s4680_s5, %s4680_s5, %s3917_s14  }
  0x5d   : > { %s3918_s24 = smov [#allocation4]  }
  0x5e   : > { %s538_s3 = sshll.u32 %s3918_s24, 4  ;;  %s539_s3 = int_to_ptr.vmem [resolvable:$true] %s538_s3 }
  0x5f   : > { %s3690_s27 = scalar_lea.vmem %s539_s3, 32  ;;  %p3698_p10 = scmp.lt.s32.totalorder %s539_s3, %s539_s3 }
  0x60   : > { %p3691_p9 = scmp.ne.s32.totalorder %s539_s3, %s3690_s27  ;;  %p3699_p1 = scmp.lt.s32.totalorder %s3690_s27, %s3690_s27 }
  0x62   : > { %p3693_p3 = pnand %p3691_p9, %p3599_p13  ;;  %p3700_p2 = por %p3699_p1, %p3698_p10 }
  0x64   : > { %p3694_p4 = pneg %p3693_p3 }
  0x66   : > { %p3701_p5 = pnand %p3700_p2, %p3694_p4 }
  0x68   : > { %3704 = shalt.err (!%p3701_p5)
}
  0x69   : > { %s3919_s8 = smov 16   ;;  %s3920_s19 = smov 1  }
  0x6a   : > { %s4719_s21 = sld [smem:[#allocation32_spill]]  ;;  %s3921_s18 = smov [#allocation9]  }
  0x6b   : > { %s572_s20 = sshll.u32 %s3921_s18, 4  ;;  %s3296_s30 = smul.u32 3, %s4107_s17  ;;  %s573_s20 = int_to_ptr.vmem [resolvable:$true] %s572_s20 }
  0x6c   : > { %s3297_s2 = smul.u32 48, %s3905_s28  ;;  %s3716_s10 = scalar_lea.vmem %s573_s20, 16 }
  0x6d   : > { %p3717_p7 = scmp.ne.s32.totalorder %s573_s20, %s3716_s10  ;;  %s3723_s24 = scalar_lea.vmem %s573_s20, 32 }
  0x6e   : > { %p3724_p4 = scmp.lt.s32.totalorder %s573_s20, %s573_s20  ;;  %p3725_p10 = scmp.lt.s32.totalorder %s3723_s24, %s3716_s10 }
  0x6f   : > { %p3719_p9 = pnand %p3717_p7, %p3599_p13 }
  0x70   : > { %3329 = dma.hbm_to_vmem [thread:$0]  (!%p4082_p11), %s4719_s21, 32, %s539_s3, [#allocation5], %s3919_s8, %s3919_s8, %s3920_s19  }
  0x71   : > { %p3720_p3 = pneg %p3719_p9  ;;  %p3726_p1 = por %p3725_p10, %p3724_p4 }
  0x73   : > { %p3727_p2 = pnand %p3726_p1, %p3720_p3 }
  0x75   : > { %3730 = shalt.err (!%p3727_p2)
}
  0x76   : > { %s4720_s4 = sld [smem:[#allocation35_spill]]  ;;  %s608_s21 = scalar_lea.vmem [#allocation12], %s3296_s30 }
  0x77   : > { %s4721_s6 = sld [smem:[#allocation37_spill]]  ;;  %s616_s18 = sshll.u32 %s608_s21, 4  ;;  %s617_s18 = int_to_ptr.vmem [resolvable:$true] %s616_s18 }
  0x78   : > { %s2993_s5 = sshll.u32 %s4107_s17, 8  ;;  %s3744_s10 = scalar_lea.vmem %s617_s18, 48 }
  0x79   : > { %p3745_p13 = scmp.ne.s32.totalorder %s617_s18, %s3744_s10  ;;  %s3922_s22 = smov [#allocation12]  }
  0x7a   : > { %s3749_s24 = sshll.u32 %s3922_s22, 4  ;;  %s3750_s24 = int_to_ptr.vmem [resolvable:$false] %s3749_s24 }
  0x7b   : > { %p3747_p5 = pnand %p3745_p13, %p4135_p12  ;;  %s3751_s3 = scalar_lea.vmem %s3750_s24, 96 }
  0x7c   : > { %3335 = dma.hbm_to_vmem [thread:$0]  (!%p4082_p11), %s4720_s4, 16, %s573_s20, [#allocation8]  }
  0x7d   : > { %s614_s16 = scalar_lea.hbm %s4721_s6, %s3297_s2  ;;  %p3748_p7 = pneg %p3747_p5 }
  0x7e   : > { %p3752_p9 = scmp.lt.s32.totalorder %s617_s18, %s3750_s24  ;;  %p3753_p3 = scmp.lt.s32.totalorder %s3751_s3, %s3744_s10 }
  0x80   : > { %p3754_p11 = por %p3753_p3, %p3752_p9 }
  0x82   : > { %p3755_p4 = pnand %p3754_p11, %p3748_p7 }
  0x84   : > { %3758 = shalt.err (!%p3755_p4)
}
  0x85   : > { %3342 = dma.hbm_to_vmem [thread:$0]  (!%p4120_p0), %s614_s16, 48, %s617_s18, %s4131_s9  }
  0x86   : > { %s3126_s20 = sshll.u32 %s3905_s28, 12  ;;  %s666_s30 = scalar_lea.vmem [#allocation15], %s2993_s5 }
  0x87   : > { %s673_s2 = sshll.u32 %s666_s30, 4  ;;  %s4722_s11 = sld [smem:[#allocation42_spill]]  ;;  %s674_s2 = int_to_ptr.vmem [resolvable:$true] %s673_s2 }
  0x88   : > { %s3772_s21 = scalar_lea.vmem %s674_s2, 4096  ;;  %s3923_s10 = smov [#allocation15]  }
  0x89   : > { %p3773_p10 = scmp.ne.s32.totalorder %s674_s2, %s3772_s21  ;;  %s3777_s22 = sshll.u32 %s3923_s10, 4  ;;  %s3778_s22 = int_to_ptr.vmem [resolvable:$false] %s3777_s22 }
  0x8a   : > { %s3779_s24 = scalar_lea.vmem %s3778_s22, 8192  ;;  %p3780_p13 = scmp.lt.s32.totalorder %s674_s2, %s3778_s22 }
  0x8b   : > { %p3775_p1 = pnand %p3773_p10, %p4135_p12  ;;  %p3781_p5 = scmp.lt.s32.totalorder %s3779_s24, %s3772_s21 }
  0x8d   : > { %s672_s23 = scalar_lea.hbm %s4722_s11, %s3126_s20  ;;  %p3776_p2 = pneg %p3775_p1 }
  0x8e   : > { %p3782_p7 = por %p3781_p5, %p3780_p13 }
  0x90   : > { %p3783_p9 = pnand %p3782_p7, %p3776_p2 }
  0x92   : > { %3786 = shalt.err (!%p3783_p9)
}
  0x93   : > { %s3924_s9 = smov 256   ;;  %s4723_s13 = sld [smem:[#allocation44_spill]] }
  0x94   : > { %3348 = dma.hbm_to_vmem [thread:$0]  (!%p4120_p0), %s672_s23, 4096, %s674_s2, %s4151_s26, %s3924_s9, %s3924_s9, %s3919_s8  }
  0x95   : > { %s694_s30 = scalar_lea.vmem [#allocation16], %s2993_s5  ;;  %s691_s19 = scalar_lea.sflag [#allocation17], %s4107_s17 }
  0x96   : > { %s701_s27 = sshll.u32 %s694_s30, 4  ;;  %s3925_s10 = smov [#allocation16]   ;;  %s702_s27 = int_to_ptr.vmem [resolvable:$true] %s701_s27 }
  0x97   : > { %s3800_s21 = scalar_lea.vmem %s702_s27, 4096  ;;  %s3805_s22 = sshll.u32 %s3925_s10, 4  ;;  %s3806_s22 = int_to_ptr.vmem [resolvable:$false] %s3805_s22 }
  0x98   : > { %p3801_p3 = scmp.ne.s32.totalorder %s702_s27, %s3800_s21  ;;  %s3807_s24 = scalar_lea.vmem %s3806_s22, 8192 }
  0x99   : > { %s700_s3 = scalar_lea.hbm %s4723_s13, %s3126_s20  ;;  %p3808_p10 = scmp.lt.s32.totalorder %s702_s27, %s3806_s22 }
  0x9a   : > { %p3803_p11 = pnand %p3801_p3, %p4135_p12  ;;  %p3809_p1 = scmp.lt.s32.totalorder %s3807_s24, %s3800_s21 }
  0x9c   : > { %p3804_p4 = pneg %p3803_p11  ;;  %p3810_p2 = por %p3809_p1, %p3808_p10 }
  0x9e   : > { %p3811_p13 = pnand %p3810_p2, %p3804_p4 }
  0xa0   : > { %3814 = shalt.err (!%p3811_p13)
}
  0xa1   : > { %s4724_s26 = smov 64   ;;  %731 = sbr.rel (%p4073_p8) target bundleno = 3591 (0xe07), region = 88 }
  0xa2   : > { %3351 = dma.hbm_to_vmem [thread:$0]  (!%p4120_p0), %s700_s3, 4096, %s702_s27, %s691_s19, %s4724_s26, %s4724_s26, %s3917_s14  }
  0xa3   : > { %p4725_p12 = scmp.eq.s32.totalorder (!%p4073_p8), %s4053_s0, 0 }
  0xa6   : > { %3864 = dma.done.wait (%p4725_p12), [#allocation5], 32   ;;  %p4726_p5 = pmov %p4725_p12 }
  0xa8   : > { %3866 = vsyncadd (%p4726_p5), [#allocation5], 4294967264  ;;  %p4727_p7 = pmov %p4726_p5 }
  0xa9   : > { %p4728_p9 = pmov %p4726_p5 }
  0xaa   : > { %3868 = dma.done.wait (%p4727_p7), [#allocation8], 32  }
  0xab   : > { %3870 = vsyncadd (%p4728_p9), [#allocation8], 4294967264  ;;  %s745_s17 = sand.u32 1, %s4053_s0   ;;  %s747_s15 = sand.u32 1, %s3893_s25  }
  0xac   : > { %s3298_s5 = smul.u32 192, %s747_s15  ;;  %s746_s1 = scalar_lea.sflag [#allocation11], %s745_s17 }
  0xae   : > { %s4227_s14 = scalar_lea.vmem [#allocation10], %s3298_s5 }
  0xaf   : > { %3872 = dma.done.wait (%p4068_p6), %s746_s1, 3120  }
  0xb0   : > { %3874 = vsyncadd (%p4068_p6), %s746_s1, 4294964176  ;;  %s3299_s8 = smul.u32 3, %s747_s15  ;;  %s3003_s20 = sshll.u32 %s747_s15, 6 }
  0xb1   : > { %s764_s23 = scalar_lea.sflag [#allocation14], %s745_s17  ;;  %s4235_s9 = scalar_lea.vmem [#allocation13], %s3003_s20 }
  0xb2   : > { %s4233_s2 = scalar_lea.vmem [#allocation12], %s3299_s8 }
  0xb3   : > { %3876 = dma.done.wait (%p4068_p6), %s764_s23, 5120  }
  0xb4   : > { %3878 = vsyncadd (%p4068_p6), %s764_s23, 4294962176  ;;  %s3004_s16 = sshll.u32 %s747_s15, 8  ;;  %s782_s3 = scalar_lea.sflag [#allocation17], %s747_s15 }
  0xb5   : > { %s4241_s18 = scalar_lea.vmem [#allocation15], %s3004_s16  ;;  %s4243_s30 = scalar_lea.vmem [#allocation16], %s3004_s16 }
  0xb6   : > { %3880 = dma.done.wait (%p4068_p6), %s782_s3, 4096  }
  0xb7   : > { %3882 = vsyncadd (%p4068_p6), %s782_s3, 4294963200  ;;  %s4730_s27 = sld [smem:[#allocation26_spill]] }
  0xb8   : > { %s4733_s8 = sld [smem:[#allocation41_spill]] }
  0xb9   : > { %s4734_s4 = sld [smem:[#allocation43_spill]] }
  0xba   : > { %s4735_s7 = sld [smem:[#allocation45_spill]] }
  0xbb   : > { %s4736_s24 = sld [smem:[#allocation46_spill]] }
  0xbc   : > { %s4737_s12 = sld [smem:[#allocation47_spill]] }
  0xbd   : > { %p896_p8 = scmp.lt.s32.totalorder %s4730_s27, 1  ;;  %p3007_p6 = scmp.ne.s32.totalorder %s4730_s27, 0 }
  0xbf   : > { %s4251_s19 = scalar_select %p896_p8, %s4730_s27, 1 }
  0xc0   : > { %923 = sbr.rel (%p3007_p6) target bundleno = 514 (0x202), region = 124 }
  0xc1   : > { %s904_s20 = scalar_lea.vmem %s4733_s8, %s4251_s19  ;;  %s3006_s23 = sshll.u32 %s4251_s19, 2 }
  0xc2   : > { %s4269_s21 = scalar_lea.vmem %s4734_s4, %s3006_s23  ;;  %s911_s11 = scalar_lea.vmem %s4735_s7, %s4251_s19 }
  0xc3   : > { %s914_s28 = scalar_lea.vmem %s4736_s24, %s4251_s19  ;;  %s917_s15 = scalar_lea.vmem %s4737_s12, %s4251_s19 }
  0xc4   : > { %s4738_s8 = sld [smem:[#allocation31_spill]] (!%p3007_p6) }
  0xc5   : > { %v3008_v17 = vld [vmem:[#allocation7] ss:$0 sm:$0xff]  ;;  %v3009_v19 = vld [vmem:[#allocation9] ss:$0 sm:$0xff] }
  0xca   : > { %v924_v0 = vld [vmem:[%s4738_s8] sm:$0xff]  ;;  %v925_v1 = vld [vmem:[%s4738_s8 + $0x8] sm:$0xff] }
  0xcb   : > { %928 = vadd.xlane.f32.xlu0 %v924_v0 }
  0xcf   : > { %930 = vadd.xlane.f32.xlu0 %v925_v1 }
 0x154   : > { %v929_v2 = vpop.xlane.xlu0 %928 }
 0x155   : > { %v933_v3 = vmul.f32 0.0078125, %v929_v2 }
 0x157   : > { %v935_v4 = vsub.f32 %v924_v0, %v933_v3 }
 0x158   : > { %v931_v5 = vpop.xlane.xlu0 %930 }
 0x159   : > { %v934_v6 = vmul.f32 0.0078125, %v931_v5  ;;  %v937_v7 = vmul.f32 %v935_v4, %v935_v4 }
 0x15b   : > { %v936_v8 = vsub.f32 %v925_v1, %v934_v6  ;;  %939 = vadd.xlane.f32.xlu1 %v937_v7 }
 0x15d   : > { %v938_v9 = vmul.f32 %v936_v8, %v936_v8 }
 0x15f   : > { %941 = vadd.xlane.f32.xlu1 %v938_v9 }
 0x1e4   : > { %v940_v10 = vpop.xlane.xlu1 %939 }
 0x1e5   : > { %v943_v11 = vmul.f32 0.0078125, %v940_v10 }
 0x1e7   : > { %v945_v12 = vadd.f32 1e-12, %v943_v11 }
 0x1e8   : > { %v942_v13 = vpop.xlane.xlu1 %941 }
 0x1e9   : > { %3427 = vrsqrt.f32 %v945_v12  ;;  %v944_v14 = vmul.f32 0.0078125, %v942_v13 }
 0x1eb   : > { %v946_v15 = vadd.f32 1e-12, %v944_v14 }
 0x1ed   : > { %3429 = vrsqrt.f32 %v946_v15 }
 0x1f6   : > { %v3428_v16 = vpop.eup %3427 }
 0x1f7   : > { %v949_v18 = vmul.f32 %v3428_v16, %v935_v4 }
 0x1f9   : > { %v957_v20 = vmul.f32 %v3008_v17, %v949_v18 }
 0x1fa   : > { %v3430_v21 = vpop.eup %3429 }
 0x1fb   : > { %v965_v22 = vadd.f32 %v3009_v19, %v957_v20  ;;  %v950_v23 = vmul.f32 %v3430_v21, %v936_v8 }
 0x1fd   : > { %967 = vst [vmem:[#allocation2] sm:$0xff] %v965_v22  ;;  %v958_v24 = vmul.f32 %v3008_v17, %v950_v23 }
 0x1ff   : > { %v966_v25 = vadd.f32 %v3009_v19, %v958_v24 }
 0x201   : > { %968 = vst [vmem:[#allocation2 + $0x8] sm:$0xff] %v966_v25 }
 0x202 PF: > { %v3431_v26 = vld [vmem:[%s4227_s14 + $0xac] ss:$12 sps:$4 sm:$0xff]   ;;  %v3433_v27 = vld [vmem:[%s4227_s14 + $0xa8] ss:$12 sps:$4 sm:$0xff]   ;;  %v3926_v28 = vmov 0   ;;  %v3927_v29 = vmov 0.0   ;;  %v1012_v55 = vlaneseq }
 0x203   : > { %1187 = vmatprep.mubr.bf16.mxu0 %v3926_v28  ;;  %3206 = vmatprep.subr.bf16.mxu1 %v3927_v29  ;;  %v3434_v30 = vld [vmem:[%s4227_s14 + $0x94] ss:$12 sps:$4 sm:$0xff]   ;;  %v3436_v31 = vld [vmem:[%s4227_s14 + $0x90] ss:$12 sps:$4 sm:$0xff]   ;;  %v3439_v33 = vld [vmem:[%s4227_s14 + $0x78] ss:$12 sps:$4 sm:$0xff]  }
 0x204   : > { %1155 = vmatprep.subr.bf16.mxu0 %v3431_v26  ;;  %v3437_v32 = vld [vmem:[%s4227_s14 + $0x7c] ss:$12 sps:$4 sm:$0xff]   ;;  %v3440_v34 = vld [vmem:[%s4227_s14 + $0x64] ss:$12 sps:$4 sm:$0xff]   ;;  %v3442_v35 = vld [vmem:[%s4227_s14 + $0x60] ss:$12 sps:$4 sm:$0xff]  }
 0x205   : > { %1156 = vmatpush1.bf16.msra.mxu0 %v3433_v27  ;;  %v3443_v36 = vld [vmem:[%s4227_s14 + $0x4c] ss:$12 sps:$4 sm:$0xff]   ;;  %v3455_v37 = vld [vmem:[%s4227_s14 + $0xb0] ss:$12 sps:$4 sm:$0xff]   ;;  %v3445_v39 = vld [vmem:[%s4227_s14 + $0x48] ss:$12 sps:$4 sm:$0xff]  }
 0x206   : > { %1157 = vmatprep.subr.bf16.mxu0 %v3434_v30  ;;  %3207 = vmatpush3.bf16.msra.mxu1 %v3455_v37  ;;  %v3456_v38 = vld [vmem:[%s4227_s14 + $0x98] ss:$12 sps:$4 sm:$0xff]   ;;  %v3446_v40 = vld [vmem:[%s4227_s14 + $0x34] ss:$12 sps:$4 sm:$0xff]   ;;  %v3448_v42 = vld [vmem:[%s4227_s14 + $0x30] ss:$12 sps:$4 sm:$0xff]  }
 0x207   : > { %3208 = vmatprep.subr.bf16.mxu1 %v3927_v29  ;;  %v3457_v41 = vld [vmem:[%s4227_s14 + $0x80] ss:$12 sps:$4 sm:$0xff]   ;;  %v3449_v43 = vld [vmem:[%s4227_s14 + $0x1c] ss:$12 sps:$4 sm:$0xff]   ;;  %v3451_v45 = vld [vmem:[%s4227_s14 + $0x18] ss:$12 sps:$4 sm:$0xff]  }
 0x208   : > { %v3458_v44 = vld [vmem:[%s4227_s14 + $0x68] ss:$12 sps:$4 sm:$0xff]   ;;  %v3452_v46 = vld [vmem:[%s4227_s14 + $0x4] ss:$12 sps:$4 sm:$0xff]   ;;  %v3454_v48 = vld [vmem:[%s4227_s14] ss:$12 sps:$4 sm:$0xff]  }
 0x209   : > { %1158 = vmatpush1.bf16.msra.mxu0 %v3436_v31  ;;  %v3459_v47 = vld [vmem:[%s4227_s14 + $0x50] ss:$12 sps:$4 sm:$0xff]   ;;  %v4318_v50 = vld [vmem:[#allocation2 + $0x8] sm:$0xff]  ;;  %vm3928_vm0 = vmmov 0   ;;  %v4337_v56 = vshrl.u32 %v1012_v55, 7  ;;  %vm1257_vm1 = vcmask 523264  }
 0x20a   : > { %1159 = vmatprep.subr.bf16.mxu0 %v3437_v32  ;;  %3209 = vmatpush3.bf16.msra.mxu1 %v3456_v38  ;;  %v4316_v49 = vld [vmem:[#allocation2] sm:$0xff]  ;;  %v3462_v54 = vld [vmem:[%s4227_s14 + $0x8] ss:$12 sps:$4 sm:$0xff]   ;;  %vm1378_vm2 = vcmask 1043456   ;;  %vm1350_vm3 = vcmask 64512   ;;  %s3929_s6 = smov 64  }
 0x20b   : > { %3210 = vmatprep.subr.bf16.mxu1 %v3927_v29  ;;  %v3460_v51 = vld [vmem:[%s4227_s14 + $0x38] ss:$12 sps:$4 sm:$0xff]   ;;  %v971_v52 = vpack.c.bf16 %v4318_v50, %v4316_v49  ;;  %v3461_v53 = vld [vmem:[%s4227_s14 + $0x20] ss:$12 sps:$4 sm:$0xff]   ;;  %3222 = vmatprep.mubr.msk.bf16.mxu1 %vm3928_vm0, %v3927_v29  ;;  %v1018_v57 = vsub.s32 1, %v4337_v56  ;;  %v4344_v61 = vsub.s32 0, %v4337_v56 }
 0x20c   : > { %v1010_v58 = vld [vmem:[%s4233_s2] sm:$0x7]  ;;  %v1022_v12 = vsub.s32 2, %v4337_v56  ;;  %v972_v22 = vld [vmem:[#allocation4] sm:$0x1]  ;;  %vm1704_vm4 = vcmask 1048064  }
 0x20d   : > { %1160 = vmatpush1.bf16.msra.mxu0 %v3439_v33  ;;  %v1019_v59 = vrot.slane %v1010_v58, %v1018_v57  ;;  %v1015_v1 = vrot.slane %v1010_v58, %v4344_v61  ;;  %v974_v23 = vsub.f32 1.0, %v972_v22  ;;  %v973_v25 = vld [vmem:[#allocation4 + $0x1] sm:$0x1]  ;;  %s4739_s14 = sld [smem:[#allocation39_spill]] }
 0x20e   : > { %1161 = vmatprep.subr.bf16.mxu0 %v3440_v34  ;;  %3211 = vmatpush3.bf16.msra.mxu1 %v3457_v41  ;;  %v1023_v13 = vrot.slane %v1010_v58, %v1022_v12  ;;  %v975_v27 = vsub.f32 1.0, %v973_v25  ;;  %s4741_s27 = sld [smem:[#allocation40_spill]] }
 0x20f   : > { %3212 = vmatprep.subr.bf16.mxu1 %v3927_v29  ;;  %v976_v24 = vmul.f32 -1e+09, %v974_v23  ;;  %s4747_s1 = sld [smem:[#allocation26_spill]] }
 0x210   : > { %v977_v32 = vmul.f32 -1e+09, %v975_v27 }
 0x211   : > { %1162 = vmatpush1.bf16.msra.mxu0 %v3442_v35  ;;  %v4369_v26 = vrot.slane %v976_v24, %v4344_v61 }
 0x212   : > { %1163 = vmatprep.subr.bf16.mxu0 %v3443_v36  ;;  %3213 = vmatpush3.bf16.msra.mxu1 %v3458_v44  ;;  %v4374_v36 = vrot.slane %v977_v32, %v4344_v61 }
 0x213   : > { %3214 = vmatprep.subr.bf16.mxu1 %v3927_v29  ;;  %s4740_s2 = scalar_lea.vmem %s4739_s14, %s4251_s19 }
 0x214   : > { %s4742_s24 = scalar_lea.vmem %s4741_s27, %s4251_s19 }
 0x215   : > { %1164 = vmatpush1.bf16.msra.mxu0 %v3445_v39  ;;  %p3120_p0 = scmp.ne.s32.totalorder %s4747_s1, 1 }
 0x216   : > { %1165 = vmatprep.subr.bf16.mxu0 %v3446_v40  ;;  %3215 = vmatpush3.bf16.msra.mxu1 %v3459_v47 }
 0x217   : > { %3216 = vmatprep.subr.bf16.mxu1 %v3927_v29 }
 0x219   : > { %1166 = vmatpush1.bf16.msra.mxu0 %v3448_v42 }
 0x21a   : > { %1167 = vmatprep.subr.bf16.mxu0 %v3449_v43  ;;  %3217 = vmatpush3.bf16.msra.mxu1 %v3460_v51 }
 0x21b   : > { %3218 = vmatprep.subr.bf16.mxu1 %v3927_v29 }
 0x21d   : > { %1168 = vmatpush1.bf16.msra.mxu0 %v3451_v45 }
 0x21e   : > { %1169 = vmatprep.subr.bf16.mxu0 %v3452_v46  ;;  %3219 = vmatpush3.bf16.msra.mxu1 %v3461_v53 }
 0x21f   : > { %3220 = vmatprep.subr.bf16.mxu1 %v3927_v29 }
 0x221   : > { %1170 = vmatpush1.bf16.msra.mxu0 %v3454_v48 }
 0x222   : > { %3250 = vmatprep.subr.bf16.mxu0 %v3927_v29  ;;  %3221 = vmatpush3.bf16.msra.mxu1 %v3462_v54 }
 0x223   : > { %3226 = vmatprep.subr.bf16.mxu1 %v3927_v29 }
 0x224   : > { %1188 = vmatmul.mubr.bf16.vlgmr.msra.gmra.mxu0 %v971_v52 }
 0x225   : > { %3252 = vmatprep.mubr.msk.bf16.mxu0 %vm3928_vm0, %v3927_v29  ;;  %3223 = vmatmul.mubr.bf16.vlgmr.msra.gmra.mxu1 %v971_v52 }
 0x226   : > { %3228 = vmatprep.mubr.msk.bf16.mxu1 %vm3928_vm0, %v3927_v29 }
 0x2e4   : > { %v1189_v60 = vpop.f32.mrf.mxu0 }
 0x2e5   : > { %v1190_v6 = vadd.f32 %v1189_v60, %v1015_v1  ;;  %v1232_v14 = vpop.f32.mrf.mxu1 }
 0x2e6   : > { %v1191_v62 = vpop.f32.mrf.mxu0  ;;  %v1233_v15 = vadd.f32 %v1232_v14, %v1023_v13 }
 0x2e7   : > { %v1192_v63 = vadd.f32 %v1191_v62, %v1019_v59  ;;  %v4349_v8 = vpack.c.bf16 %v1190_v6, %v1190_v6  ;;  %v3224_v16 = vpop.f32.mrf.mxu1 }
 0x2e8   : > { %v1193_v0 = vpop.f32.mrf.mxu0  ;;  %v4363_v17 = vpack.c.bf16 %v1233_v15, %v1233_v15 }
 0x2e9   : > { %v1241_v2 = vpack.c.bf16 %v1192_v63, %v1192_v63  ;;  %v1194_v10 = vadd.f32 %v1193_v0, %v1015_v1  ;;  %v1235_v18 = vpop.f32.mrf.mxu1 }
 0x2ea   : > { %v1195_v3 = vpop.f32.mrf.mxu0  ;;  %v1380_v19 = vsel %vm1378_vm2, %v4363_v17, 0  ;;  %v1236_v20 = vadd.f32 %v1235_v18, %v1023_v13 }
 0x2eb   : > { %v1262_v4 = vsel %vm1257_vm1, %v1241_v2, 0  ;;  %v1196_v5 = vadd.f32 %v1195_v3, %v1019_v59  ;;  %v1240_v11 = vpack.c.bf16 %v1194_v10, %v1194_v10  ;;  %v3225_v21 = vpop.f32.mrf.mxu1 }
 0x2ec   : > { %3227 = vmatpush3.bf16.xpose.msra.mxu1 %v1262_v4  ;;  %v1244_v63 = vpack.c.bf16 %v1236_v20, %v1236_v20 }
 0x2ed   : > { %3232 = vmatprep.subr.bf16.mxu1 %v3927_v29  ;;  %v1242_v7 = vpack.c.bf16 %v1196_v5, %v1196_v5 }
 0x2ef   : > { %v1308_v9 = vsel %vm1257_vm1, %v1242_v7, 0 }
 0x2f3   : > { %3229 = vmatmul.mubr.msk.bf16.vlgmr.msra.gmra.mxu1 %vm1257_vm1, %v4349_v8 }
 0x2f4   : > { %3233 = vmatpush3.bf16.xpose.msra.mxu1 %v1308_v9  ;;  %3234 = vmatprep.mubr.msk.bf16.mxu1 %vm3928_vm0, %v3927_v29 }
 0x2f5   : > { %3238 = vmatprep.subr.bf16.mxu1 %v3927_v29 }
 0x2fb   : > { %3235 = vmatmul.mubr.msk.bf16.vlgmr.msra.gmra.mxu1 %vm1257_vm1, %v1240_v11 }
 0x2fc   : > { %3240 = vmatprep.mubr.msk.bf16.mxu1 %vm3928_vm0, %v3927_v29  ;;  %3239 = vmatpush3.bf16.msra.mxu1 %v1380_v19 }
 0x2fd   : > { %3244 = vmatprep.subr.bf16.mxu1 %v3927_v29 }
 0x3b3   : > { %v1298_v30 = vpop.f32.mrf.mxu1 }
 0x3b4   : > { %v1299_v31 = vadd.f32 %v1298_v30, %v4369_v26 }
 0x3b5   : > { %v3230_v33 = vpop.f32.mrf.mxu1 }
 0x3b6   : > { %v1351_v34 = vsel %vm1350_vm3, %v1299_v31, -inf }
 0x3b7   : > { %1352 = vmax.xlane.f32.xlu0 %v1351_v34  ;;  %v1301_v35 = vpop.f32.mrf.mxu1 }
 0x3b9   : > { %v3231_v37 = vpop.f32.mrf.mxu1 }
 0x3bb   : > { %v1344_v38 = vpop.f32.mrf.mxu1 }
 0x3bc   : > { %v1345_v39 = vadd.f32 %v1344_v38, %v4374_v36 }
 0x3bd   : > { %v3236_v40 = vpop.f32.mrf.mxu1 }
 0x3be   : > { %v1354_v41 = vsel %vm1350_vm3, %v1345_v39, -inf }
 0x3bf   : > { %1355 = vmax.xlane.f32.xlu0 %v1354_v41  ;;  %v1347_v42 = vpop.f32.mrf.mxu1 }
 0x3c1   : > { %v3237_v43 = vpop.f32.mrf.mxu1 }
 0x3d5   : > { %1474 = vrot.lane.b32.xlu0 %v1241_v2, %s3929_s6  ;;  %v1426_v2 = vsel %vm1378_vm2, %v1244_v63, 0 }
 0x440   : > { %v1353_v44 = vpop.xlane.xlu0 %1352 }
 0x441   : > { %v1357_v45 = vsub.f32 %v1299_v31, %v1353_v44 }
 0x443   : > { %v1359_v46 = vmul.f32 1.442695, %v1357_v45 }
 0x445   : > { %3551 = vpow2.f32 %v1359_v46 }
 0x448   : > { %v1356_v47 = vpop.xlane.xlu0 %1355 }
 0x449   : > { %v1358_v54 = vsub.f32 %v1345_v39, %v1356_v47 }
 0x44b   : > { %v1361_v55 = vmul.f32 1.442695, %v1358_v54 }
 0x44c   : > { %v1475_v48 = vpop.permute.xlu0 %1474 }
 0x44d   : > { %v1480_v51 = vsel %vm1257_vm1, %v1475_v48, 0  ;;  %3553 = vpow2.f32 %v1361_v55 }
 0x44e   : > { %3251 = vmatpush3.bf16.xpose.msra.mxu0 %v1480_v51 }
 0x44f   : > { %3262 = vmatprep.subr.bf16.mxu0 %v3927_v29 }
 0x452   : > { %v3552_v52 = vpop.eup %3551 }
 0x453   : > { %v1363_v53 = vsel %vm1350_vm3, %v3552_v52, 0.0 }
 0x454   : > { %1364 = vadd.xlane.f32.xlu1 %v1363_v53 }
 0x45a   : > { %v3554_v58 = vpop.eup %3553 }
 0x45b   : > { %v1366_v59 = vsel %vm1350_vm3, %v3554_v58, 0.0 }
 0x465   : > { %1526 = vrot.lane.b32.xlu1 %v1242_v7, %s3929_s6 }
 0x489   : > { %1367 = vadd.xlane.f32.xlu1 %v1366_v59 }
 0x49a   : > { %1471 = vrot.lane.b32.xlu1 %v4349_v8, %s3929_s6 }
 0x49e   : > { %1523 = vrot.lane.b32.xlu1 %v1240_v11, %s3929_s6 }
 0x4dd   : > { %v1365_v60 = vpop.xlane.xlu1 %1364 }
 0x4de   : > { %3555 = vrcp.f32 %v1365_v60  ;;  %v3463_v60 = vld [vmem:[%s4235_s9 + $0x38] sm:$0xff]  }
 0x4e1   : > { %v1527_v3 = vpop.permute.xlu1 %1526 }
 0x4e2   : > { %v1532_v9 = vsel %vm1257_vm1, %v1527_v3, 0  ;;  %v3469_v3 = vld [vmem:[%s4235_s9 + $0x8] sm:$0xff]  }
 0x4eb   : > { %v3556_v62 = vpop.eup %3555 }
 0x4ec   : > { %v1371_v0 = vmul.f32 %v3556_v62, %v3552_v52  ;;  %v3464_v62 = vld [vmem:[%s4235_s9 + $0x30] sm:$0xff]  }
 0x4ee   : > { %v1373_v1 = vpack.c.bf16 %v1371_v0, %v1371_v0  ;;  %v3466_v0 = vld [vmem:[%s4235_s9 + $0x20] sm:$0xff]  }
 0x4f0   : > { %3241 = vmatmul.mubr.msk.bf16.vlgmr.msra.gmra.mxu1 %vm1350_vm3, %v1373_v1  ;;  %v3467_v1 = vld [vmem:[%s4235_s9 + $0x18] sm:$0xff]  }
 0x4f1   : > { %3245 = vmatpush3.bf16.msra.mxu1 %v1426_v2  ;;  %3246 = vmatprep.mubr.msk.bf16.mxu1 %vm3928_vm0, %v3927_v29  ;;  %v3468_v2 = vld [vmem:[%s4235_s9 + $0x10] sm:$0xff]  }
 0x4f2   : > { %3256 = vmatprep.subr.bf16.mxu1 %v3927_v29 }
 0x512   : > { %v1368_v4 = vpop.xlane.xlu1 %1367 }
 0x513   : > { %3557 = vrcp.f32 %v1368_v4 }
 0x516   : > { %v1472_v5 = vpop.permute.xlu1 %1471 }
 0x517   : > { %3253 = vmatmul.mubr.msk.bf16.vlgmr.msra.gmra.mxu0 %vm1257_vm1, %v1472_v5 }
 0x518   : > { %3264 = vmatprep.mubr.msk.bf16.mxu0 %vm3928_vm0, %v3927_v29 }
 0x51a   : > { %v1524_v10 = vpop.permute.xlu1 %1523 }
 0x520   : > { %v3558_v6 = vpop.eup %3557 }
 0x521   : > { %v1372_v7 = vmul.f32 %v3558_v6, %v3554_v58  ;;  %v3470_v6 = vld [vmem:[%s4235_s9] sm:$0xff]  }
 0x523   : > { %v1374_v8 = vpack.c.bf16 %v1372_v7, %v1372_v7 }
 0x525   : > { %3247 = vmatmul.mubr.msk.bf16.vlgmr.msra.gmra.mxu1 %vm1350_vm3, %v1374_v8 }
 0x526   : > { %3257 = vmatpush3.bf16.xpose.msra.mxu1 %v1532_v9  ;;  %3258 = vmatprep.mubr.msk.bf16.mxu1 %vm3928_vm0, %v3927_v29 }
 0x527   : > { %3268 = vmatprep.subr.bf16.mxu1 %v3927_v29 }
 0x52d   : > { %3259 = vmatmul.mubr.msk.bf16.vlgmr.msra.gmra.mxu1 %vm1257_vm1, %v1524_v10 }
 0x52e   : > { %3270 = vmatprep.mubr.msk.bf16.mxu1 %vm3928_vm0, %v3927_v29 }
 0x5b0   : > { %v1416_v11 = vpop.f32.mrf.mxu1 }
 0x5b1   : > { %1468 = vst.msk [vmem:[#allocation3] sm:$0xff] %vm1257_vm1, %v1416_v11 }
 0x5b2   : > { %v3242_v13 = vpop.f32.mrf.mxu1 }
 0x5b4   : > { %v1419_v14 = vpop.f32.mrf.mxu1 }
 0x5b6   : > { %v3243_v15 = vpop.f32.mrf.mxu1 }
 0x5d7   : > { %v1516_v16 = vpop.f32.mrf.mxu0 }
 0x5d8   : > { %v1517_v18 = vadd.f32 %v1516_v16, %v4369_v26 }
 0x5d9   : > { %v3254_v19 = vpop.f32.mrf.mxu0 }
 0x5da   : > { %v1574_v20 = vsel %vm1350_vm3, %v1517_v18, -inf  ;;  %v3042_v19 = vld [vmem:[%s4740_s2] ss:$0 sm:$0xff] }
 0x5db   : > { %1575 = vmax.xlane.f32.xlu0 %v1574_v20  ;;  %v1519_v21 = vpop.f32.mrf.mxu0 }
 0x5dd   : > { %v3255_v22 = vpop.f32.mrf.mxu0 }
 0x5e5   : > { %v1462_v23 = vpop.f32.mrf.mxu1 }
 0x5e6   : > { %1469 = vst.msk [vmem:[#allocation3 + $0x8] sm:$0xff] %vm1257_vm1, %v1462_v23 }
 0x5e7   : > { %v3248_v24 = vpop.f32.mrf.mxu1 }
 0x5e9   : > { %v1465_v25 = vpop.f32.mrf.mxu1 }
 0x5eb   : > { %v3249_v27 = vpop.f32.mrf.mxu1 }
 0x5ed   : > { %v1568_v30 = vpop.f32.mrf.mxu1 }
 0x5ee   : > { %v1569_v31 = vadd.f32 %v1568_v30, %v4374_v36 }
 0x5ef   : > { %v3260_v32 = vpop.f32.mrf.mxu1 }
 0x5f0   : > { %v1577_v33 = vsel %vm1350_vm3, %v1569_v31, -inf  ;;  %v3473_v32 = vld [vmem:[%s4241_s18 + $0xe4] ss:$16 sps:$4 sm:$0xff]  }
 0x5f1   : > { %1578 = vmax.xlane.f32.xlu1 %v1577_v33  ;;  %v1571_v26 = vpop.f32.mrf.mxu1  ;;  %v3476_v33 = vld [vmem:[%s4241_s18 + $0xec] ss:$16 sps:$4 sm:$0xff]  }
 0x5f3   : > { %v3261_v34 = vpop.f32.mrf.mxu1 }
 0x602   : > { %1648 = vrot.lane.b32.xlu1 %v1244_v63, %s3929_s6  ;;  %v3465_v63 = vld [vmem:[%s4235_s9 + $0x28] sm:$0xff]  }
 0x664   : > { %v1576_v35 = vpop.xlane.xlu0 %1575 }
 0x665   : > { %v1580_v37 = vsub.f32 %v1517_v18, %v1576_v35 }
 0x667   : > { %v1582_v38 = vmul.f32 1.442695, %v1580_v37 }
 0x669   : > { %3559 = vpow2.f32 %v1582_v38 }
 0x676   : > { %v3560_v39 = vpop.eup %3559 }
 0x677   : > { %v1586_v40 = vsel %vm1350_vm3, %v3560_v39, 0.0 }
 0x678   : > { %1587 = vadd.xlane.f32.xlu0 %v1586_v40  ;;  %v3479_v40 = vld [vmem:[%s4241_s18 + $0xc4] ss:$16 sps:$4 sm:$0xff]  }
 0x67a   : > { %v1579_v41 = vpop.xlane.xlu1 %1578 }
 0x67b   : > { %v1581_v42 = vsub.f32 %v1569_v31, %v1579_v41  ;;  %v3471_v31 = vld [vmem:[%s4241_s18 + $0xe0] ss:$16 sps:$4 sm:$0xff]   ;;  %v3482_v41 = vld [vmem:[%s4241_s18 + $0xcc] ss:$16 sps:$4 sm:$0xff]  }
 0x67d   : > { %v1584_v43 = vmul.f32 1.442695, %v1581_v42  ;;  %v3477_v42 = vld [vmem:[%s4241_s18 + $0xc0] ss:$16 sps:$4 sm:$0xff]  }
 0x67e   : > { %v1649_v36 = vpop.permute.xlu1 %1648 }
 0x67f   : > { %3561 = vpow2.f32 %v1584_v43  ;;  %v1654_v44 = vsel %vm1378_vm2, %v1649_v36, 0  ;;  %v3480_v43 = vld [vmem:[%s4241_s18 + $0xc8] ss:$16 sps:$4 sm:$0xff]   ;;  %v3485_v36 = vld [vmem:[%s4241_s18 + $0xa4] ss:$16 sps:$4 sm:$0xff]  }
 0x680   : > { %3269 = vmatpush3.bf16.msra.mxu1 %v1654_v44  ;;  %v3488_v44 = vld [vmem:[%s4241_s18 + $0xac] ss:$16 sps:$4 sm:$0xff]  }
 0x681   : > { %2080 = vmatprep.subr.bf16.mxu1 %v3473_v32  ;;  %v3523_v32 = vld [vmem:[%s4243_s30 + $0x70] sm:$0xff]  }
 0x68c   : > { %v3562_v45 = vpop.eup %3561 }
 0x68d   : > { %v1589_v46 = vsel %vm1350_vm3, %v3562_v45, 0.0 }
 0x68e   : > { %1590 = vadd.xlane.f32.xlu0 %v1589_v46  ;;  %v3486_v46 = vld [vmem:[%s4241_s18 + $0xa8] ss:$16 sps:$4 sm:$0xff]  }
 0x6a4   : > { %1599 = vrot.lane.b32.xlu0 %v4363_v17, %s3929_s6 }
 0x701   : > { %v1588_v47 = vpop.xlane.xlu0 %1587 }
 0x702   : > { %3563 = vrcp.f32 %v1588_v47  ;;  %v3489_v47 = vld [vmem:[%s4241_s18 + $0x80] ss:$16 sps:$4 sm:$0xff]  }
 0x70f   : > { %v3564_v48 = vpop.eup %3563 }
 0x710   : > { %v1594_v52 = vmul.f32 %v3564_v48, %v3560_v39  ;;  %v3491_v48 = vld [vmem:[%s4241_s18 + $0x84] ss:$16 sps:$4 sm:$0xff]  }
 0x712   : > { %v1596_v55 = vpack.c.bf16 %v1594_v52, %v1594_v52  ;;  %v3494_v52 = vld [vmem:[%s4241_s18 + $0x8c] ss:$16 sps:$4 sm:$0xff]  }
 0x717   : > { %v1591_v51 = vpop.xlane.xlu0 %1590 }
 0x718   : > { %3565 = vrcp.f32 %v1591_v51  ;;  %v3492_v51 = vld [vmem:[%s4241_s18 + $0x88] ss:$16 sps:$4 sm:$0xff]  }
 0x71b   : > { %v1600_v53 = vpop.permute.xlu0 %1599 }
 0x71c   : > { %v1605_v54 = vsel %vm1378_vm2, %v1600_v53, 0  ;;  %v3497_v53 = vld [vmem:[%s4241_s18 + $0x64] ss:$16 sps:$4 sm:$0xff]  }
 0x71d   : > { %3263 = vmatpush3.bf16.msra.mxu0 %v1605_v54  ;;  %v3500_v54 = vld [vmem:[%s4241_s18 + $0x6c] ss:$16 sps:$4 sm:$0xff]  }
 0x71e   : > { %3274 = vmatprep.subr.bf16.mxu0 %v3927_v29 }
 0x720   : > { %3265 = vmatmul.mubr.msk.bf16.vlgmr.msra.gmra.mxu0 %vm1350_vm3, %v1596_v55  ;;  %v3495_v55 = vld [vmem:[%s4241_s18 + $0x60] ss:$16 sps:$4 sm:$0xff]  }
 0x721   : > { %3290 = vmatprep.mubr.msk.bf16.mxu0 %vm3928_vm0, %v3927_v29  ;;  %3275 = vmatpush3.bf16.msra.mxu0 %v3463_v60  ;;  %v3501_v60 = vld [vmem:[%s4241_s18 + $0x40] ss:$16 sps:$4 sm:$0xff]  }
 0x722   : > { %3276 = vmatprep.subr.bf16.mxu0 %v3927_v29 }
 0x725   : > { %v3566_v17 = vpop.eup %3565  ;;  %3277 = vmatpush3.bf16.msra.mxu0 %v3464_v62  ;;  %v3504_v62 = vld [vmem:[%s4241_s18 + $0x48] ss:$16 sps:$4 sm:$0xff]  }
 0x726   : > { %v1595_v58 = vmul.f32 %v3566_v17, %v3562_v45  ;;  %3278 = vmatprep.subr.bf16.mxu0 %v3927_v29  ;;  %v3483_v45 = vld [vmem:[%s4241_s18 + $0xa0] ss:$16 sps:$4 sm:$0xff]   ;;  %v3498_v17 = vld [vmem:[%s4241_s18 + $0x68] ss:$16 sps:$4 sm:$0xff]  }
 0x728   : > { %v1597_v59 = vpack.c.bf16 %v1595_v58, %v1595_v58  ;;  %v3503_v58 = vld [vmem:[%s4241_s18 + $0x44] ss:$16 sps:$4 sm:$0xff]  }
 0x729   : > { %3279 = vmatpush3.bf16.msra.mxu0 %v3465_v63  ;;  %v3509_v63 = vld [vmem:[%s4241_s18 + $0x24] ss:$16 sps:$4 sm:$0xff]  }
 0x72a   : > { %3271 = vmatmul.mubr.msk.bf16.vlgmr.msra.gmra.mxu1 %vm1350_vm3, %v1597_v59  ;;  %3280 = vmatprep.subr.bf16.mxu0 %v3927_v29  ;;  %v3506_v59 = vld [vmem:[%s4241_s18 + $0x4c] ss:$16 sps:$4 sm:$0xff]  }
 0x72b   : > { %2112 = vmatprep.mubr.bf16.mxu1 %v3926_v28  ;;  %2081 = vmatpush1.bf16.msra.mxu1 %v3471_v31  ;;  %v3522_v31 = vld [vmem:[%s4243_s30 + $0xb8] sm:$0xff]  }
 0x72c   : > { %2082 = vmatprep.subr.bf16.mxu1 %v3479_v40  ;;  %v3534_v40 = vld [vmem:[%s4243_s30 + $0xa0] sm:$0xff]  }
 0x72d   : > { %3281 = vmatpush3.bf16.msra.mxu0 %v3466_v0  ;;  %v3512_v0 = vld [vmem:[%s4241_s18 + $0x2c] ss:$16 sps:$4 sm:$0xff]  }
 0x72e   : > { %3282 = vmatprep.subr.bf16.mxu0 %v3927_v29 }
 0x72f   : > { %2083 = vmatpush1.bf16.msra.mxu1 %v3477_v42  ;;  %v3536_v42 = vld [vmem:[%s4243_s30 + $0xd8] sm:$0xff]  }
 0x730   : > { %2084 = vmatprep.subr.bf16.mxu1 %v3485_v36  ;;  %v3538_v36 = vld [vmem:[%s4243_s30 + $0x98] sm:$0xff]  }
 0x731   : > { %3283 = vmatpush3.bf16.msra.mxu0 %v3467_v1  ;;  %v3507_v1 = vld [vmem:[%s4241_s18 + $0x20] ss:$16 sps:$4 sm:$0xff]  }
 0x732   : > { %3284 = vmatprep.subr.bf16.mxu0 %v3927_v29 }
 0x733   : > { %2085 = vmatpush1.bf16.msra.mxu1 %v3483_v45  ;;  %v3540_v45 = vld [vmem:[%s4243_s30 + $0xd0] sm:$0xff]  }
 0x734   : > { %2086 = vmatprep.subr.bf16.mxu1 %v3491_v48  ;;  %v3543_v48 = vld [vmem:[%s4243_s30 + $0x48] sm:$0xff]  }
 0x735   : > { %3285 = vmatpush3.bf16.msra.mxu0 %v3468_v2  ;;  %v3510_v2 = vld [vmem:[%s4241_s18 + $0x28] ss:$16 sps:$4 sm:$0xff]  }
 0x736   : > { %3286 = vmatprep.subr.bf16.mxu0 %v3927_v29 }
 0x737   : > { %2087 = vmatpush1.bf16.msra.mxu1 %v3489_v47  ;;  %v3542_v47 = vld [vmem:[%s4243_s30 + $0x90] sm:$0xff]  }
 0x738   : > { %2088 = vmatprep.subr.bf16.mxu1 %v3497_v53  ;;  %v3546_v53 = vld [vmem:[%s4243_s30 + $0x88] sm:$0xff]  }
 0x739   : > { %3287 = vmatpush3.bf16.msra.mxu0 %v3469_v3  ;;  %v3515_v3 = vld [vmem:[%s4241_s18 + $0x4] ss:$16 sps:$4 sm:$0xff]  }
 0x73a   : > { %3288 = vmatprep.subr.bf16.mxu0 %v3927_v29 }
 0x73b   : > { %2089 = vmatpush1.bf16.msra.mxu1 %v3495_v55  ;;  %v3548_v55 = vld [vmem:[%s4243_s30 + $0xc0] sm:$0xff]  }
 0x73c   : > { %2090 = vmatprep.subr.bf16.mxu1 %v3503_v58  ;;  %v3550_v58 = vld [vmem:[%s4243_s30 + $0x80] sm:$0xff]  }
 0x73d   : > { %3289 = vmatpush3.bf16.msra.mxu0 %v3470_v6  ;;  %v3516_v6 = vld [vmem:[%s4241_s18 + $0x8] ss:$16 sps:$4 sm:$0xff]  }
 0x73e   : > { %2123 = vmatprep.subr.bf16.mxu0 %v3476_v33  ;;  %v3525_v33 = vld [vmem:[%s4243_s30 + $0x30] sm:$0xff]  }
 0x73f   : > { %2091 = vmatpush1.bf16.msra.mxu1 %v3501_v60  ;;  %v1914_v60 = vsub.s32 3, %v4337_v56 }
 0x740   : > { %2092 = vmatprep.subr.bf16.mxu1 %v3509_v63 }
 0x743   : > { %2093 = vmatpush1.bf16.msra.mxu1 %v3507_v1 }
 0x744   : > { %2094 = vmatprep.subr.bf16.mxu1 %v3515_v3 }
 0x7e0   : > { %v1641_v4 = vpop.f32.mrf.mxu0 }
 0x7e1   : > { %1698 = vrot.lane.b32.xlu1 %v1641_v4, %s3929_s6  ;;  %v3518_v4 = vld [vmem:[%s4241_s18 + $0xc] ss:$16 sps:$4 sm:$0xff]  }
 0x7e2   : > { %v3266_v5 = vpop.f32.mrf.mxu0 }
 0x7e3   : > { %v3513_v5 = vld [vmem:[%s4241_s18] ss:$16 sps:$4 sm:$0xff]  }
 0x7e4   : > { %v1644_v7 = vpop.f32.mrf.mxu0  ;;  %2095 = vmatpush1.bf16.msra.mxu1 %v3513_v5 }
 0x7e6   : > { %v3267_v8 = vpop.f32.mrf.mxu0 }
 0x7ea   : > { %v1690_v9 = vpop.f32.mrf.mxu1 }
 0x7eb   : > { %1700 = vrot.lane.b32.xlu1 %v1690_v9, %s3929_s6 }
 0x7ec   : > { %v3272_v10 = vpop.f32.mrf.mxu1 }
 0x7ee   : > { %v1693_v11 = vpop.f32.mrf.mxu1 }
 0x7f0   : > { %v3273_v13 = vpop.f32.mrf.mxu1 }
 0x853   : > { %v1699_v14 = vpop.permute.xlu1 %1698 }
 0x854   : > { %1705 = vst.msk [vmem:[#allocation3] sm:$0xff] %vm1704_vm4, %v1699_v14 }
 0x85b   : > { %v1707_v16 = vld [vmem:[#allocation3] sm:$0xff] }
 0x85d   : > { %v1701_v15 = vpop.permute.xlu1 %1700 }
 0x85e   : > { %1706 = vst.msk [vmem:[#allocation3 + $0x8] sm:$0xff] %vm1704_vm4, %v1701_v15 }
 0x865   : > { %v1708_v18 = vld [vmem:[#allocation3 + $0x8] sm:$0xff] }
 0x866   : > { %v1709_v29 = vpack.c.bf16 %v1708_v18, %v1707_v16  ;;  %v3051_v16 = vld [vmem:[%s4742_s24] ss:$0 sm:$0xff] }
 0x868   : > { %3291 = vmatmul.mubr.bf16.vlgmr.msra.gmra.mxu0 %v1709_v29 }
 0x869   : > { %2155 = vmatprep.mubr.bf16.mxu0 %v3926_v28  ;;  %v3474_v28 = vld [vmem:[%s4241_s18 + $0xe8] ss:$16 sps:$4 sm:$0xff]  }
 0x86a   : > { %2124 = vmatpush1.bf16.msra.mxu0 %v3474_v28  ;;  %v3524_v28 = vld [vmem:[%s4243_s30 + $0xf0] sm:$0xff]  }
 0x86b   : > { %2125 = vmatprep.subr.bf16.mxu0 %v3482_v41  ;;  %v3535_v41 = vld [vmem:[%s4243_s30 + $0x58] sm:$0xff]  }
 0x86e   : > { %2126 = vmatpush1.bf16.msra.mxu0 %v3480_v43  ;;  %v3537_v43 = vld [vmem:[%s4243_s30 + $0x18] sm:$0xff]  }
 0x86f   : > { %2127 = vmatprep.subr.bf16.mxu0 %v3488_v44  ;;  %v3539_v44 = vld [vmem:[%s4243_s30 + $0x50] sm:$0xff]  }
 0x872   : > { %2128 = vmatpush1.bf16.msra.mxu0 %v3486_v46  ;;  %v3541_v46 = vld [vmem:[%s4243_s30 + $0x10] sm:$0xff]  }
 0x873   : > { %2129 = vmatprep.subr.bf16.mxu0 %v3494_v52  ;;  %v3545_v52 = vld [vmem:[%s4243_s30 + $0x8] sm:$0xff]  }
 0x876   : > { %2130 = vmatpush1.bf16.msra.mxu0 %v3492_v51  ;;  %v3544_v51 = vld [vmem:[%s4243_s30 + $0xc8] sm:$0xff]  }
 0x877   : > { %2131 = vmatprep.subr.bf16.mxu0 %v3500_v54  ;;  %v3547_v54 = vld [vmem:[%s4243_s30 + $0x40] sm:$0xff]  }
 0x87a   : > { %2132 = vmatpush1.bf16.msra.mxu0 %v3498_v17  ;;  %v3549_v17 = vld [vmem:[%s4243_s30] sm:$0xff]  }
 0x87b   : > { %2133 = vmatprep.subr.bf16.mxu0 %v3506_v59  ;;  %v1898_v59 = vld [vmem:[%s4269_s21] sm:$0xf] }
 0x87c   : > { %v1911_v63 = vrot.slane %v1898_v59, %v1022_v12  ;;  %v1915_v1 = vrot.slane %v1898_v59, %v1914_v60 }
 0x87e   : > { %2134 = vmatpush1.bf16.msra.mxu0 %v3504_v62  ;;  %v1903_v62 = vrot.slane %v1898_v59, %v4344_v61 }
 0x87f   : > { %2135 = vmatprep.subr.bf16.mxu0 %v3512_v0  ;;  %v1907_v0 = vrot.slane %v1898_v59, %v1018_v57 }
 0x882   : > { %2136 = vmatpush1.bf16.msra.mxu0 %v3510_v2 }
 0x883   : > { %2137 = vmatprep.subr.bf16.mxu0 %v3518_v4 }
 0x886   : > { %2138 = vmatpush1.bf16.msra.mxu0 %v3516_v6 }
 0x928   : > { %v1815_v20 = vpop.f32.mrf.mxu0 }
 0x929   : > { %v1816_v21 = vadd.f32 %v3042_v19, %v1815_v20  ;;  %v3052_v20 = vld [vmem:[%s904_s20] ss:$0 sm:$0xff] }
 0x92a   : > { %v3292_v22 = vpop.f32.mrf.mxu0 }
 0x92b   : > { %v1822_v23 = vadd.f32 %v1816_v21, %v4316_v49 }
 0x92c   : > { %v1818_v24 = vpop.f32.mrf.mxu0 }
 0x92d   : > { %v1819_v25 = vadd.f32 %v3042_v19, %v1818_v24  ;;  %1826 = vadd.xlane.f32.xlu0 %v1822_v23 }
 0x92e   : > { %v3293_v27 = vpop.f32.mrf.mxu0 }
 0x92f   : > { %v1823_v30 = vadd.f32 %v1819_v25, %v4318_v50  ;;  %v3519_v25 = vld [vmem:[%s4243_s30 + $0x78] sm:$0xff]  }
 0x930   : > { %v3520_v27 = vld [vmem:[%s4243_s30 + $0xf8] sm:$0xff]   ;;  %3162 = vmatprep.subr.bf16.mxu1 %v3519_v25 }
 0x931   : > { %1828 = vadd.xlane.f32.xlu1 %v1823_v30  ;;  %3184 = vmatprep.subr.bf16.mxu0 %v3520_v27 }
 0x9b6   : > { %v1827_v49 = vpop.xlane.xlu0 %1826 }
 0x9b7   : > { %v1831_v26 = vmul.f32 0.0078125, %v1827_v49  ;;  %v3526_v49 = vld [vmem:[%s4243_s30 + $0xb0] sm:$0xff]  }
 0x9b9   : > { %v4451_v34 = vsub.f32 %v1822_v23, %v1831_v26  ;;  %v3527_v26 = vld [vmem:[%s4243_s30 + $0x68] sm:$0xff]  }
 0x9ba   : > { %v1829_v35 = vpop.xlane.xlu1 %1828 }
 0x9bb   : > { %v1832_v50 = vmul.f32 0.0078125, %v1829_v35  ;;  %v1835_v37 = vmul.f32 %v4451_v34, %v4451_v34  ;;  %v3529_v35 = vld [vmem:[%s4243_s30 + $0x28] sm:$0xff]  }
 0x9bd   : > { %v4455_v38 = vsub.f32 %v1823_v30, %v1832_v50  ;;  %1837 = vadd.xlane.f32.xlu0 %v1835_v37  ;;  %v3521_v30 = vld [vmem:[%s4243_s30 + $0x38] sm:$0xff]   ;;  %v3530_v50 = vld [vmem:[%s4243_s30 + $0xa8] sm:$0xff]   ;;  %v3531_v37 = vld [vmem:[%s4243_s30 + $0x60] sm:$0xff]  }
 0x9bf   : > { %v1836_v39 = vmul.f32 %v4455_v38, %v4455_v38 }
 0x9c1   : > { %1839 = vadd.xlane.f32.xlu0 %v1836_v39  ;;  %v3533_v39 = vld [vmem:[%s4243_s30 + $0x20] sm:$0xff]  }
 0xa46   : > { %v1838_v7 = vpop.xlane.xlu0 %1837 }
 0xa47   : > { %v1841_v8 = vmul.f32 0.0078125, %v1838_v7 }
 0xa49   : > { %v1843_v9 = vadd.f32 1e-12, %v1841_v8 }
 0xa4a   : > { %v1840_v10 = vpop.xlane.xlu0 %1839 }
 0xa4b   : > { %3567 = vrsqrt.f32 %v1843_v9  ;;  %v1842_v11 = vmul.f32 0.0078125, %v1840_v10 }
 0xa4d   : > { %v1844_v13 = vadd.f32 1e-12, %v1842_v11 }
 0xa4f   : > { %3569 = vrsqrt.f32 %v1844_v13 }
 0xa58   : > { %v3568_v14 = vpop.eup %3567 }
 0xa59   : > { %v1847_v15 = vmul.f32 %v3568_v14, %v4451_v34  ;;  %v3528_v34 = vld [vmem:[%s4243_s30 + $0xe8] sm:$0xff]  }
 0xa5b   : > { %v1855_v19 = vmul.f32 %v3051_v16, %v1847_v15 }
 0xa5c   : > { %v3570_v18 = vpop.eup %3569 }
 0xa5d   : > { %v1848_v29 = vmul.f32 %v3570_v18, %v4455_v38  ;;  %v4499_v22 = vadd.f32 %v3052_v20, %v1855_v19  ;;  %v3532_v38 = vld [vmem:[%s4243_s30 + $0xe0] sm:$0xff]  }
 0xa5f   : > { %v1856_v21 = vmul.f32 %v3051_v16, %v1848_v29 }
 0xa61   : > { %v4501_v23 = vadd.f32 %v3052_v20, %v1856_v21 }
 0xa63   : > { %v1865_v24 = vpack.c.bf16 %v4501_v23, %v4499_v22 }
 0xa65   : > { %2113 = vmatmul.mubr.bf16.vlgmr.msra.gmra.mxu1 %v1865_v24  ;;  %2156 = vmatmul.mubr.bf16.vlgmr.msra.gmra.mxu0 %v1865_v24 }
 0xa66   : > { %3163 = vmatpush3.bf16.msra.mxu1 %v3521_v30  ;;  %3185 = vmatpush3.bf16.msra.mxu0 %v3522_v31 }
 0xa67   : > { %3164 = vmatprep.subr.bf16.mxu1 %v3523_v32  ;;  %3186 = vmatprep.subr.bf16.mxu0 %v3524_v28 }
 0xa6a   : > { %3165 = vmatpush3.bf16.msra.mxu1 %v3525_v33  ;;  %3187 = vmatpush3.bf16.msra.mxu0 %v3526_v49 }
 0xa6b   : > { %3166 = vmatprep.subr.bf16.mxu1 %v3527_v26  ;;  %3188 = vmatprep.subr.bf16.mxu0 %v3528_v34 }
 0xa6e   : > { %3167 = vmatpush3.bf16.msra.mxu1 %v3529_v35  ;;  %3189 = vmatpush3.bf16.msra.mxu0 %v3530_v50 }
 0xa6f   : > { %3168 = vmatprep.subr.bf16.mxu1 %v3531_v37  ;;  %3190 = vmatprep.subr.bf16.mxu0 %v3532_v38 }
 0xa72   : > { %3169 = vmatpush3.bf16.msra.mxu1 %v3533_v39  ;;  %3191 = vmatpush3.bf16.msra.mxu0 %v3534_v40 }
 0xa73   : > { %3170 = vmatprep.subr.bf16.mxu1 %v3535_v41  ;;  %3192 = vmatprep.subr.bf16.mxu0 %v3536_v42 }
 0xa76   : > { %3171 = vmatpush3.bf16.msra.mxu1 %v3537_v43  ;;  %3193 = vmatpush3.bf16.msra.mxu0 %v3538_v36 }
 0xa77   : > { %3172 = vmatprep.subr.bf16.mxu1 %v3539_v44  ;;  %3194 = vmatprep.subr.bf16.mxu0 %v3540_v45 }
 0xa7a   : > { %3173 = vmatpush3.bf16.msra.mxu1 %v3541_v46  ;;  %3195 = vmatpush3.bf16.msra.mxu0 %v3542_v47 }
 0xa7b   : > { %3174 = vmatprep.subr.bf16.mxu1 %v3543_v48  ;;  %3196 = vmatprep.subr.bf16.mxu0 %v3544_v51 }
 0xa7e   : > { %3175 = vmatpush3.bf16.msra.mxu1 %v3545_v52  ;;  %3197 = vmatpush3.bf16.msra.mxu0 %v3546_v53 }
 0xa7f   : > { %3176 = vmatprep.subr.bf16.mxu1 %v3547_v54  ;;  %3198 = vmatprep.subr.bf16.mxu0 %v3548_v55 }
 0xa82   : > { %3177 = vmatpush3.bf16.msra.mxu1 %v3549_v17  ;;  %3199 = vmatpush3.bf16.msra.mxu0 %v3550_v58 }
 0xb25   : > { %v2114_v2 = vpop.f32.mrf.mxu1  ;;  %v2157_v3 = vpop.f32.mrf.mxu0 }
 0xb26   : > { %v4544_v4 = vadd.f32 %v2114_v2, %v1903_v62  ;;  %v4546_v5 = vadd.f32 %v2157_v3, %v1911_v63 }
 0xb27   : > { %v2116_v6 = vpop.f32.mrf.mxu1  ;;  %v2159_v7 = vpop.f32.mrf.mxu0 }
 0xb28   : > { %v2166_v8 = vmul.f32 %v4544_v4, %v4544_v4  ;;  %v2168_v61 = vmul.f32 %v4546_v5, %v4546_v5  ;;  %v4552_v9 = vadd.f32 %v2116_v6, %v1907_v0  ;;  %v4554_v12 = vadd.f32 %v2159_v7, %v1915_v1 }
 0xb29   : > { %v2118_v56 = vpop.f32.mrf.mxu1  ;;  %v2161_v57 = vpop.f32.mrf.mxu0 }
 0xb2a   : > { %v2174_v10 = vmul.f32 %v2166_v8, %v4544_v4  ;;  %v2176_v11 = vmul.f32 %v2168_v61, %v4546_v5  ;;  %v2167_v13 = vmul.f32 %v4552_v9, %v4552_v9  ;;  %v2169_v14 = vmul.f32 %v4554_v12, %v4554_v12 }
 0xb2b   : > { %v4562_v15 = vadd.f32 %v2118_v56, %v1903_v62  ;;  %v4564_v16 = vadd.f32 %v2161_v57, %v1911_v63  ;;  %v2120_v18 = vpop.f32.mrf.mxu1  ;;  %v2163_v29 = vpop.f32.mrf.mxu0 }
 0xb2c   : > { %v2182_v19 = vmul.f32 0.044715, %v2174_v10  ;;  %v2184_v20 = vmul.f32 0.044715, %v2176_v11  ;;  %v2175_v21 = vmul.f32 %v2167_v13, %v4552_v9  ;;  %v2177_v24 = vmul.f32 %v2169_v14, %v4554_v12 }
 0xb2d   : > { %v2170_v25 = vmul.f32 %v4562_v15, %v4562_v15  ;;  %v2172_v27 = vmul.f32 %v4564_v16, %v4564_v16  ;;  %v4572_v30 = vadd.f32 %v2120_v18, %v1907_v0  ;;  %v4574_v31 = vadd.f32 %v2163_v29, %v1915_v1 }
 0xb2e   : > { %v2190_v32 = vadd.f32 %v2182_v19, %v4544_v4  ;;  %v2192_v28 = vadd.f32 %v2184_v20, %v4546_v5  ;;  %v2183_v33 = vmul.f32 0.044715, %v2175_v21  ;;  %v2185_v49 = vmul.f32 0.044715, %v2177_v24 }
 0xb2f   : > { %v2178_v26 = vmul.f32 %v2170_v25, %v4562_v15  ;;  %v2180_v34 = vmul.f32 %v2172_v27, %v4564_v16  ;;  %v2171_v35 = vmul.f32 %v4572_v30, %v4572_v30  ;;  %v2173_v50 = vmul.f32 %v4574_v31, %v4574_v31 }
 0xb30   : > { %v2198_v37 = vmul.f32 0.7978846, %v2190_v32  ;;  %v2200_v38 = vmul.f32 0.7978846, %v2192_v28  ;;  %v2191_v39 = vadd.f32 %v2183_v33, %v4552_v9  ;;  %v2193_v40 = vadd.f32 %v2185_v49, %v4554_v12 }
 0xb31   : > { %v2186_v41 = vmul.f32 0.044715, %v2178_v26  ;;  %v2188_v42 = vmul.f32 0.044715, %v2180_v34  ;;  %v2179_v43 = vmul.f32 %v2171_v35, %v4572_v30  ;;  %v2181_v36 = vmul.f32 %v2173_v50, %v4574_v31 }
 0xb32   : > { %3571 = vtanh.f32 %v2198_v37  ;;  %v2199_v44 = vmul.f32 0.7978846, %v2191_v39  ;;  %v2201_v45 = vmul.f32 0.7978846, %v2193_v40 }
 0xb33   : > { %3573 = vtanh.f32 %v2200_v38  ;;  %v2194_v46 = vadd.f32 %v2186_v41, %v4562_v15  ;;  %v2196_v47 = vadd.f32 %v2188_v42, %v4564_v16  ;;  %v2187_v48 = vmul.f32 0.044715, %v2179_v43 }
 0xb34   : > { %3575 = vtanh.f32 %v2199_v44  ;;  %v2189_v51 = vmul.f32 0.044715, %v2181_v36 }
 0xb35   : > { %3577 = vtanh.f32 %v2201_v45  ;;  %v2202_v52 = vmul.f32 0.7978846, %v2194_v46  ;;  %v2204_v53 = vmul.f32 0.7978846, %v2196_v47  ;;  %v2195_v54 = vadd.f32 %v2187_v48, %v4572_v30 }
 0xb36   : > { %v2197_v55 = vadd.f32 %v2189_v51, %v4574_v31 }
 0xb37   : > { %3579 = vtanh.f32 %v2202_v52  ;;  %v2203_v17 = vmul.f32 0.7978846, %v2195_v54 }
 0xb38   : > { %3581 = vtanh.f32 %v2204_v53  ;;  %v2205_v58 = vmul.f32 0.7978846, %v2197_v55 }
 0xb39   : > { %3583 = vtanh.f32 %v2203_v17 }
 0xb3a   : > { %3585 = vtanh.f32 %v2205_v58 }
 0xb3f   : > { %v3572_v59 = vpop.eup %3571 }
 0xb40   : > { %v3574_v60 = vpop.eup %3573  ;;  %v2214_v2 = vadd.f32 1.0, %v3572_v59 }
 0xb41   : > { %v3576_v62 = vpop.eup %3575  ;;  %v2216_v7 = vadd.f32 1.0, %v3574_v60 }
 0xb42   : > { %v3578_v63 = vpop.eup %3577  ;;  %v2215_v0 = vadd.f32 1.0, %v3576_v62  ;;  %v2222_v14 = vmul.f32 0.5, %v2214_v2  ;;  %v3118_v2 = vld [vmem:[%s914_s28] ss:$0 sm:$0xff]  ;;  %s4748_s28 = sld [smem:[#allocation33_spill]] (!%p3120_p0) }
 0xb43   : > { %v2217_v3 = vadd.f32 1.0, %v3578_v63  ;;  %v2224_v20 = vmul.f32 0.5, %v2216_v7 }
 0xb44   : > { %v3580_v1 = vpop.eup %3579  ;;  %v2223_v13 = vmul.f32 0.5, %v2215_v0  ;;  %v2230_v33 = vmul.f32 %v2222_v14, %v4544_v4  ;;  %v3085_v4 = vld [vmem:[%s911_s11] ss:$0 sm:$0xff] }
 0xb45   : > { %v3582_v6 = vpop.eup %3581  ;;  %v2218_v8 = vadd.f32 1.0, %v3580_v1  ;;  %v2225_v19 = vmul.f32 0.5, %v2217_v3  ;;  %v2232_v34 = vmul.f32 %v2224_v20, %v4546_v5 }
 0xb46   : > { %v3584_v61 = vpop.eup %3583  ;;  %v2220_v56 = vadd.f32 1.0, %v3582_v6  ;;  %v2231_v32 = vmul.f32 %v2223_v13, %v4552_v9  ;;  %v3119_v6 = vld [vmem:[%s917_s15] ss:$0 sm:$0xff] }
 0xb47   : > { %v3586_v57 = vpop.eup %3585  ;;  %v2226_v10 = vmul.f32 0.5, %v2218_v8  ;;  %v2219_v11 = vadd.f32 1.0, %v3584_v61  ;;  %v2233_v49 = vmul.f32 %v2225_v19, %v4554_v12 }
 0xb48   : > { %v2228_v18 = vmul.f32 0.5, %v2220_v56  ;;  %v2221_v29 = vadd.f32 1.0, %v3586_v57  ;;  %s4749_s6 = smov (!%p3120_p0), %s4748_s28 }
 0xb49   : > { %v2227_v21 = vmul.f32 0.5, %v2219_v11  ;;  %v2234_v24 = vmul.f32 %v2226_v10, %v4562_v15 }
 0xb4a   : > { %v2229_v25 = vmul.f32 0.5, %v2221_v29  ;;  %v2236_v27 = vmul.f32 %v2228_v18, %v4564_v16 }
 0xb4b   : > { %v2235_v28 = vmul.f32 %v2227_v21, %v4572_v30  ;;  %v2238_v37 = vpack.c.bf16 %v2234_v24, %v2230_v33 }
 0xb4c   : > { %v2237_v26 = vmul.f32 %v2229_v25, %v4574_v31  ;;  %v2240_v15 = vpack.c.bf16 %v2236_v27, %v2232_v34 }
 0xb4d   : > { %v2239_v35 = vpack.c.bf16 %v2235_v28, %v2231_v32 }
 0xb4e   : > { %v2241_v50 = vpack.c.bf16 %v2237_v26, %v2233_v49 }
 0xb4f   : > { %2537 = vmatprep.mubr.bf16.mxu1 %v2239_v35 }
 0xb50   : > { %2578 = vmatprep.mubr.bf16.mxu0 %v2241_v50  ;;  %2538 = vmatmul.mubr.bf16.vlgmr.msra.gmra.mxu1 %v2238_v37 }
 0xb51   : > { %2579 = vmatmul.mubr.bf16.vlgmr.msra.gmra.mxu0 %v2240_v15 }
 0xc10   : > { %v3178_v9 = vpop.f32.mrf.mxu1 }
 0xc11   : > { %v3200_v16 = vpop.f32.mrf.mxu0 }
 0xc12   : > { %v3179_v12 = vpop.f32.mrf.mxu1 }
 0xc13   : > { %v3180_v30 = vadd.f32 %v3179_v12, %v3178_v9  ;;  %v3201_v31 = vpop.f32.mrf.mxu0 }
 0xc14   : > { %v3181_v38 = vpop.f32.mrf.mxu1  ;;  %v3202_v39 = vadd.f32 %v3201_v31, %v3200_v16 }
 0xc15   : > { %v2540_v5 = vadd.f32 %v3180_v30, %v3085_v4  ;;  %v3203_v40 = vpop.f32.mrf.mxu0 }
 0xc16   : > { %v3182_v41 = vpop.f32.mrf.mxu1 }
 0xc17   : > { %v2581_v42 = vadd.f32 %v3202_v39, %v2540_v5  ;;  %v3183_v43 = vadd.f32 %v3182_v41, %v3181_v38  ;;  %v3204_v36 = vpop.f32.mrf.mxu0 }
 0xc18   : > { %v3205_v45 = vadd.f32 %v3204_v36, %v3203_v40 }
 0xc19   : > { %v2543_v44 = vadd.f32 %v3183_v43, %v3085_v4  ;;  %v2587_v46 = vadd.f32 %v2581_v42, %v4499_v22 }
 0xc1b   : > { %v2584_v47 = vadd.f32 %v3205_v45, %v2543_v44  ;;  %2591 = vadd.xlane.f32.xlu0 %v2587_v46 }
 0xc1d   : > { %v2588_v48 = vadd.f32 %v2584_v47, %v4501_v23 }
 0xc1f   : > { %2593 = vadd.xlane.f32.xlu1 %v2588_v48 }
 0xca4   : > { %v2592_v51 = vpop.xlane.xlu0 %2591 }
 0xca5   : > { %v2595_v52 = vmul.f32 0.0078125, %v2592_v51 }
 0xca7   : > { %v2597_v53 = vsub.f32 %v2587_v46, %v2595_v52 }
 0xca8   : > { %v2594_v54 = vpop.xlane.xlu1 %2593 }
 0xca9   : > { %v2596_v55 = vmul.f32 0.0078125, %v2594_v54  ;;  %v2599_v17 = vmul.f32 %v2597_v53, %v2597_v53 }
 0xcab   : > { %v2598_v58 = vsub.f32 %v2588_v48, %v2596_v55  ;;  %2601 = vadd.xlane.f32.xlu0 %v2599_v17 }
 0xcad   : > { %v2600_v59 = vmul.f32 %v2598_v58, %v2598_v58 }
 0xcaf   : > { %2603 = vadd.xlane.f32.xlu1 %v2600_v59 }
 0xd34   : > { %v2602_v60 = vpop.xlane.xlu0 %2601 }
 0xd35   : > { %v2605_v62 = vmul.f32 0.0078125, %v2602_v60 }
 0xd37   : > { %v2607_v22 = vadd.f32 1e-12, %v2605_v62 }
 0xd38   : > { %v2604_v63 = vpop.xlane.xlu1 %2603 }
 0xd39   : > { %3587 = vrsqrt.f32 %v2607_v22  ;;  %v2606_v0 = vmul.f32 0.0078125, %v2604_v63 }
 0xd3b   : > { %v2608_v23 = vadd.f32 1e-12, %v2606_v0 }
 0xd3d   : > { %3589 = vrsqrt.f32 %v2608_v23 }
 0xd46   : > { %v3588_v1 = vpop.eup %3587 }
 0xd47   : > { %v2611_v3 = vmul.f32 %v3588_v1, %v2597_v53 }
 0xd49   : > { %v2619_v7 = vmul.f32 %v3118_v2, %v2611_v3 }
 0xd4a   : > { %v3590_v8 = vpop.eup %3589 }
 0xd4b   : > { %v2627_v61 = vadd.f32 %v3119_v6, %v2619_v7  ;;  %v2612_v56 = vmul.f32 %v3590_v8, %v2598_v58 }
 0xd4d   : > { %2629 = vst [vmem:[#allocation2] sm:$0xff] %v2627_v61  ;;  %v2620_v57 = vmul.f32 %v3118_v2, %v2612_v56  ;;  %2634 = sbr.rel (%p3120_p0) target bundleno = 3569 (0xdf1), region = 128 }
 0xd4f   : > { %v2628_v10 = vadd.f32 %v3119_v6, %v2620_v57 }
 0xd51   : > { %2630 = vst [vmem:[#allocation2 + $0x8] sm:$0xff] %v2628_v10 }
 0xd52   : > { %v2635_v11 = vld [vmem:[%s4748_s28] sm:$0xff]  ;;  %vm2661_vm5 = vcmask 7168   ;;  %v2636_v13 = vld [vmem:[%s4749_s6 + $0x8] sm:$0xff]  ;;  %v3930_v14 = vmov 0  }
 0xd53   : > { %3591 = vset.pattern.permute.xlu0 %v3930_v14  ;;  %v2662_v18 = vsel %vm2661_vm5, %v2635_v11, 0.0  ;;  %v2669_v29 = vsel %vm2661_vm5, %v2636_v13, 0.0  ;;  %3592 = vset.pattern.permute.xlu1 %v3930_v14 }
 0xd54   : > { %2639 = vperm.xlu0 %3591, %v2635_v11   ;;  %v2663_v19 = vrot.slane %v2662_v18, 4  ;;  %v2670_v20 = vrot.slane %v2669_v29, 4 }
 0xd56   : > { %v2664_v21 = vadd.f32 %v2663_v19, %v2662_v18  ;;  %v2671_v24 = vadd.f32 %v2670_v20, %v2669_v29 }
 0xd58   : > { %v2665_v25 = vrot.slane %v2664_v21, 2  ;;  %v2672_v27 = vrot.slane %v2671_v24, 2  ;;  %2644 = vperm.xlu0 %3591, %v2636_v13  }
 0xd5a   : > { %v2666_v32 = vadd.f32 %v2665_v25, %v2664_v21  ;;  %v2673_v28 = vadd.f32 %v2672_v27, %v2671_v24 }
 0xd5c   : > { %v2667_v33 = vrot.slane %v2666_v32, 1  ;;  %v2674_v49 = vrot.slane %v2673_v28, 1 }
 0xd5e   : > { %v2668_v26 = vadd.f32 %v2667_v33, %v2666_v32  ;;  %v2675_v34 = vadd.f32 %v2674_v49, %v2673_v28 }
 0xd60   : > { %3593 = vrcp.f32 %v2668_v26 }
 0xd61   : > { %3595 = vrcp.f32 %v2675_v34 }
 0xd6d   : > { %v3594_v35 = vpop.eup %3593 }
 0xd6e   : > { %2680 = vperm.xlu1 %3592, %v3594_v35   ;;  %v3596_v50 = vpop.eup %3595 }
 0xd72   : > { %2685 = vperm.xlu1 %3592, %v3596_v50  }
 0xdcf   : > { %v2640_v37 = vpop.permute.xlu0 %2639 }
 0xdd0   : > { %v2647_v15 = vmul.f32 %v2640_v37, %v2627_v61 }
 0xdd2   : > { %v2649_v16 = vrot.slane %v2647_v15, 4 }
 0xdd3   : > { %v2645_v9 = vpop.permute.xlu0 %2644 }
 0xdd4   : > { %v2648_v4 = vmul.f32 %v2645_v9, %v2628_v10  ;;  %v2650_v12 = vadd.f32 %v2649_v16, %v2647_v15 }
 0xdd6   : > { %v2655_v30 = vrot.slane %v2648_v4, 4  ;;  %v2651_v31 = vrot.slane %v2650_v12, 2 }
 0xdd8   : > { %v2656_v38 = vadd.f32 %v2655_v30, %v2648_v4  ;;  %v2652_v39 = vadd.f32 %v2651_v31, %v2650_v12 }
 0xdda   : > { %v2657_v5 = vrot.slane %v2656_v38, 2  ;;  %v2653_v41 = vrot.slane %v2652_v39, 1 }
 0xddc   : > { %v2658_v40 = vadd.f32 %v2657_v5, %v2656_v38  ;;  %v2654_v42 = vadd.f32 %v2653_v41, %v2652_v39 }
 0xdde   : > { %v2659_v43 = vrot.slane %v2658_v40, 1 }
 0xde0   : > { %v2660_v45 = vadd.f32 %v2659_v43, %v2658_v40 }
 0xde9   : > { %v2681_v36 = vpop.permute.xlu1 %2680 }
 0xdea   : > { %v2688_v44 = vmul.f32 %v2681_v36, %v2654_v42 }
 0xdec   : > { %2690 = vst [vmem:[#allocation18] sm:$0x1] %v2688_v44 }
 0xded   : > { %v2686_v46 = vpop.permute.xlu1 %2685 }
 0xdee   : > { %v2689_v47 = vmul.f32 %v2686_v46, %v2660_v45 }
 0xdf0   : > { %2691 = vst [vmem:[#allocation18 + $0x1] sm:$0x1] %v2689_v47 }
 0xdf1 PF: > { %p3359_p3 = scmp.eq.s32.totalorder %s4053_s0, 1  ;;  %s3931_s19 = smov [#allocation18]  }
 0xdf2   : > { %s2701_s15 = sshll.u32 %s3931_s19, 4  ;;  %s2702_s15 = int_to_ptr.vmem [resolvable:$true] %s2701_s15 }
 0xdf3   : > { %s3815_s14 = scalar_lea.vmem %s2702_s15, 32  ;;  %p3822_p1 = scmp.lt.s32.totalorder %s2702_s15, %s2702_s15 }
 0xdf4   : > { %p3816_p11 = scmp.ne.s32.totalorder %s2702_s15, %s3815_s14  ;;  %p3823_p2 = scmp.lt.s32.totalorder %s3815_s14, %s3815_s14 }
 0xdf6   : > { %p3817_p4 = pnand %p3816_p11, %p3359_p3  ;;  %p3824_p13 = por %p3823_p2, %p3822_p1 }
 0xdf8   : > { %p3818_p10 = pneg %p3817_p4 }
 0xdfa   : > { %p3825_p12 = pnand %p3824_p13, %p3818_p10 }
 0xdfc   : > { %3828 = shalt.err (!%p3825_p12)
}
 0xdfd   : > { %s3932_s2 = smov 16   ;;  %s3933_s9 = smov 1  }
 0xdfe   : > { %s4750_s24 = sld [smem:[#allocation48_spill]] }
 0xe04   : > { %3323 = dma.vmem_to_hbm [thread:$0]  (%p3359_p3), %s2702_s15, 32, %s4750_s24, [#allocation6], %s3932_s2, %s3932_s2, %s3933_s9  }
 0xe05   : > { %3884 = dma.done.wait (%p3359_p3), [#allocation6], 32  }
 0xe06   : > { %3886 = vsyncadd (%p3359_p3), [#allocation6], 4294967264 }
 0xe07 PF: > { %s39_s29 = sadd.s32 1, %s3909_s29   ;;  %s4751_s16 = sld [smem:[#allocation25_spill]] }
 0xe08   : > { %p36_p5 = scmp.ge.s32.totalorder %s39_s29, 4   ;;  %s4752_s26 = sld [smem:[#allocation30_spill]] }
 0xe09   : > { %s4753_s27 = sld [smem:[#allocation27_spill]]  ;;  %s4755_s24 = smov %s3893_s25 }
 0xe0a   : > { %s4754_s28 = sld [smem:[#allocation29_spill]]  ;;  %38 = sbr.rel (!%p36_p5) target bundleno = 30 (0x1e), region = 223 }
 0xe0d   : > { %s4756_s25 = smov %s4751_s16 }
 0xe0f   :  { %2717 = vsyncpa [#allocation5], 1 }
 0xe10   :  { %2719 = vsyncpa [#allocation5 + $0x1], 1 }
 0xe11   :  { %2720 = vsyncpa [#allocation8], 1 }
 0xe12   :  { %2721 = vsyncpa [#allocation11], 1 }
 0xe13   :  { %2723 = vsyncpa [#allocation11 + $0x1], 1 }
 0xe14   :  { %2724 = vsyncpa [#allocation14], 1 }
 0xe15   :  { %2726 = vsyncpa [#allocation14 + $0x1], 1 }
 0xe16   :  { %2727 = vsyncpa [#allocation17], 1 }
 0xe17   :  { %2729 = vsyncpa [#allocation17 + $0x1], 1 }
 0xe18   :  { %2730 = vsyncpa [#allocation6], 1 }
 0xe19   :  { %2732 = vsyncpa [#allocation6 + $0x1], 1 }

</bundles_post_ra>
